<compile_context>
chip_gen: v7x
topology: tpu7x:2x2x1
jax: 0.10.0
libtpu: 0.0.40
codegen_flags: <defaults>
</compile_context>

<pallas_src>
import functools

import jax
import jax.numpy as jnp
from jax.experimental import pallas as pl
from jax.experimental.pallas import tpu as pltpu


def _round_up(x, m):
    return ((x + m - 1) // m) * m


def _pick_tile_rows(H, max_rows=8):
    """Largest even divisor of H that is <= max_rows (spatial tile height)."""
    th = 2
    for cand in range(2, min(H, max_rows) + 1, 2):
        if H % cand == 0:
            th = cand
    return th


def _fused_heads_kernel(xm_ref, xo_ref, w1_ref, b1_ref, w2_ref, b2_ref, out_ref, xs_ref,
                        *, cin, tile_rows, wr):
    """One (batch, row-tile) step of all fused heads.

    xm_ref : (1, Cin, TH*Wr)       bf16  main tile (padded rows [t*TH, (t+1)*TH))
    xo_ref : (1, Cin, 2*Wr)        bf16  2-row halo (padded rows [(t+1)*TH, (t+1)*TH+2))
    w1_ref : (3, Cmid_pad, 3*Cin)  bf16  3x3 conv weights, kh-major, K index = kw*Cin + c
    b1_ref : (Cmid_pad, 1)         f32
    w2_ref : (Cout_pad, Cmid_pad)  bf16  1x1 conv weights (block-diagonal over heads)
    b2_ref : (Cout_pad, 1)         f32
    out_ref: (1, Cout_pad, TH*Wr)  f32   column 0 and columns >= W+1 of each row are junk
    xs_ref : (3*Cin, 128 + (TH+2)*Wr + 128) bf16 scratch: the 3 column-shifted copies of
             the window (kw folded into the contraction).  No memset needed: every lane
             that is read for a valid output column is overwritten below each step.
    """
    G = 128                      # left guard -> every slab read starts 128-lane aligned
    L = tile_rows * wr           # output lanes of this tile (multiple of 128)
    Wo = 2 * wr                  # halo lanes

    # Build the kw-folded window copies:  xs[j*Cin + c, G + p] = window[c, p + j - 1].
    # The +/-1 lane offsets lower to one lane rotation + edge-masked stores; interiors are
    # full unmasked 128-lane stores because wr % 128 == 0.
    for j in range(3):
        dst = G + 1 - j
        rows = slice(j * cin, (j + 1) * cin)
        xs_ref[rows, dst:dst + L] = xm_ref[0]
        xs_ref[rows, dst + L:dst + L + Wo] = xo_ref[0]

    # 3x3 conv as 3 matmuls (one per kh) with K = 3*Cin; all slab reads lane-aligned.
    cmid_pad = w1_ref.shape[1]
    acc = jnp.zeros((cmid_pad, L), jnp.float32)
    for kh in range(3):
        base = G + kh * wr
        slab = xs_ref[:, base:base + L]                       # (3*Cin, L) bf16
        acc = acc + jnp.dot(w1_ref[kh], slab, preferred_element_type=jnp.float32)

    hidden = jnp.maximum(acc + b1_ref[...], 0.0).astype(jnp.bfloat16)
    y = jnp.dot(w2_ref[...], hidden, preferred_element_type=jnp.float32) + b2_ref[...]
    out_ref[0] = y.astype(out_ref.dtype)


def fused_heads_forward(x_nchw, w1, b1, w2, b2, *, max_tile_rows=8):
    """Apply all fused heads to an NCHW feature map.

    Returns (N, Cout_pad, H, Wr) f32 with Wr = round_up(W+2, 128); callers take
    y[:, lo:hi, :, 1:W+1] per head (column drop folded into the per-head channel slice).
    """
    N, Cin, H, W = x_nchw.shape
    Cmid_pad = w1.shape[1]
    Cout_pad = w2.shape[0]
    assert w1.shape == (3, Cmid_pad, 3 * Cin)
    assert Cin % 8 == 0, "last_channel must be a multiple of 8"
    assert H % 2 == 0, "even feature-map height required"

    th = _pick_tile_rows(H, max_tile_rows)       # even, divides H
    n_tiles = H // th
    Wr = _round_up(W + 2, 128)
    L = th * Wr

    # One-time spatial zero-pad + bf16 cast of the input (all later accesses aligned).
    xpad = jnp.pad(x_nchw.astype(jnp.bfloat16),
                   ((0, 0), (0, 0), (1, 1), (1, Wr - W - 1)))
    xflat = xpad.reshape(N, Cin, (H + 2) * Wr)   # metadata-only reshape

    kernel = functools.partial(_fused_heads_kernel, cin=Cin, tile_rows=th, wr=Wr)

    out_flat = pl.pallas_call(
        kernel,
        out_shape=jax.ShapeDtypeStruct((N, Cout_pad, H * Wr), jnp.float32),
        grid_spec=pltpu.PrefetchScalarGridSpec(
            num_scalar_prefetch=0,
            grid=(N, n_tiles),
            in_specs=[
                # main tile: padded rows [t*th, (t+1)*th)
                pl.BlockSpec((1, Cin, L), lambda b, t: (b, 0, t)),
                # 2-row halo: padded rows [(t+1)*th, (t+1)*th + 2)
                pl.BlockSpec((1, Cin, 2 * Wr), lambda b, t: (b, 0, (t + 1) * (th // 2))),
                pl.BlockSpec((3, Cmid_pad, 3 * Cin), lambda b, t: (0, 0, 0)),
                pl.BlockSpec((Cmid_pad, 1), lambda b, t: (0, 0)),
                pl.BlockSpec((Cout_pad, Cmid_pad), lambda b, t: (0, 0)),
                pl.BlockSpec((Cout_pad, 1), lambda b, t: (0, 0)),
            ],
            out_specs=pl.BlockSpec((1, Cout_pad, L), lambda b, t: (b, 0, t)),
            scratch_shapes=[
                pltpu.VMEM((3 * Cin, 128 + (th + 2) * Wr + 128), jnp.bfloat16)],
        ),
        compiler_params=pltpu.CompilerParams(
            dimension_semantics=("parallel", "parallel"),
            vmem_limit_bytes=32 * 1024 * 1024),
    )(xflat, xflat, w1, b1, w2, b2)

    return out_flat.reshape(N, Cout_pad, H, Wr)


class BaseModelPallas:
    """JAX/Pallas port of BaseModel's head forward pass (opt.trades = False)."""

    def __init__(self, heads, head_convs, num_stacks, last_channel,
                 prior_bias=-4.6, key=jax.random.PRNGKey(0)):
        assert num_stacks == 1
        self.heads = dict(heads)
        self.num_stacks = num_stacks
        self.last_channel = last_channel
        self.params = {}         # per-head params in PyTorch layouts (f32), for reference
        self.head_slices = {}

        cmids, couts = [], []
        for head in self.heads:
            classes = self.heads[head]
            head_conv = head_convs[head]
            assert len(head_conv) == 1, "only the len(head_conv)==1 path is implemented"
            cmid = head_conv[0]
            key, k1, k2 = jax.random.split(key, 3)
            # conv1: 3x3, bias=True. PyTorch weight layout (Cmid, Cin, 3, 3).
            w1_t = 0.05 * jax.random.normal(k1, (cmid, last_channel, 3, 3), jnp.float32)
            b1 = jnp.zeros((cmid,), jnp.float32)
            # out: 1x1, bias=True. PyTorch layout (classes, Cmid, 1, 1).
            w2_t = 0.05 * jax.random.normal(k2, (classes, cmid, 1, 1), jnp.float32)
            if 'hm' in head:
                b2 = jnp.full((classes,), prior_bias, jnp.float32)   # prior_bias fill
            else:
                b2 = jnp.zeros((classes,), jnp.float32)              # fill_fc_weights
            self.params[head] = (w1_t, b1, w2_t, b2)
            cmids.append(cmid)
            couts.append(classes)

        cmid_pad = _round_up(sum(cmids), 128)    # hidden width: lane/MXU friendly
        cout_pad = _round_up(sum(couts), 8)      # sublane friendly
        cin = last_channel

        # conv1 fused along Cmid.  Layout (kh, Cmid_pad, kw*Cin + c) so the kernel
        # contracts K = 3*Cin per kh tap (kw folded into the contraction).
        w1f = jnp.zeros((3, cmid_pad, 3 * cin), jnp.float32)
        b1f = jnp.zeros((cmid_pad, 1), jnp.float32)
        # conv2 block-diagonal over heads.
        w2f = jnp.zeros((cout_pad, cmid_pad), jnp.float32)
        b2f = jnp.zeros((cout_pad, 1), jnp.float32)
        off_m, off_o = 0, 0
        for head in self.heads:
            w1_t, b1, w2_t, b2 = self.params[head]
            cmid, classes = w1_t.shape[0], w2_t.shape[0]
            # (cmid, Cin, kh, kw) -> (kh, cmid, kw, Cin) -> (kh, cmid, kw*Cin + c)
            w1_k = jnp.transpose(w1_t, (2, 0, 3, 1)).reshape(3, cmid, 3 * cin)
            w1f = w1f.at[:, off_m:off_m + cmid, :].set(w1_k)
            b1f = b1f.at[off_m:off_m + cmid, 0].set(b1)
            w2f = w2f.at[off_o:off_o + classes, off_m:off_m + cmid].set(w2_t[:, :, 0, 0])
            b2f = b2f.at[off_o:off_o + classes, 0].set(b2)
            self.head_slices[head] = (off_o, off_o + classes)
            off_m += cmid
            off_o += classes

        # bf16 weights for the MXU; biases stay f32 (added after f32 accumulation).
        self.fused = (w1f.astype(jnp.bfloat16), b1f, w2f.astype(jnp.bfloat16), b2f)

    def img2feats(self, x_nchw):
        # TODO(synk): abstract in BaseModel; identity feature extractor (x already has
        # last_channel channels).
        return [x_nchw]

    def forward(self, x_nchw):
        cur_feat = self.img2feats(x_nchw)
        feats = [cur_feat[0]]
        out = []
        w1f, b1f, w2f, b2f = self.fused
        for s in range(self.num_stacks):
            _, _, _, W = feats[s].shape
            y = fused_heads_forward(feats[s], w1f, b1f, w2f, b2f)  # (N, Cout_pad, H, Wr)
            z = {}
            for head, (lo, hi) in self.head_slices.items():
                # single per-head slice: channel range + drop the padded columns.
                z[head] = y[:, lo:hi, :, 1:W + 1]                  # NCHW per head
            out.append(z)
        return out


def _reference_head(x_nchw, w1_t, b1, w2_t, b2):
    """Plain-JAX reference of one head, mirroring the kernel's bf16-input numerics."""
    f32 = jnp.float32
    hi = jax.lax.Precision.HIGHEST
    xq = x_nchw.astype(jnp.bfloat16).astype(f32)
    w1q = w1_t.astype(jnp.bfloat16).astype(f32)               # (Cmid, Cin, 3, 3)
    w2q = w2_t[:, :, 0, 0].astype(jnp.bfloat16).astype(f32)   # (Cout, Cmid)
    N, Cin, H, W = x_nchw.shape
    xp = jnp.pad(xq, ((0, 0), (0, 0), (1, 1), (1, 1)))
    acc = jnp.zeros((N, w1_t.shape[0], H, W), f32)
    for kh in range(3):
        for kw in range(3):
            acc = acc + jnp.einsum('nchw,mc->nmhw',
                                   xp[:, :, kh:kh + H, kw:kw + W],
                                   w1q[:, :, kh, kw], precision=hi)
    hid = jnp.maximum(acc + b1[None, :, None, None], 0.0)
    hidq = hid.astype(jnp.bfloat16).astype(f32)
    return jnp.einsum('nmhw,om->nohw', hidq, w2q, precision=hi) + b2[None, :, None, None]


if __name__ == "__main__":
    # Small shapes: batch=2, last_channel=16, spatial 16x16 (2 row-tiles per image so the
    # halo path between spatial tiles is exercised).
    N, C, H, W = 2, 16, 16, 16
    heads = {'hm': 4, 'reg': 2, 'wh': 2}
    head_convs = {'hm': [32], 'reg': [32], 'wh': [32]}

    key = jax.random.PRNGKey(0)
    kx, kp = jax.random.split(key)
    x = jax.random.normal(kx, (N, C, H, W), jnp.float32)   # PyTorch-style NCHW input

    model = BaseModelPallas(heads, head_convs, num_stacks=1, last_channel=C,
                            prior_bias=-4.6, key=kp)
    out = model.forward(x)
    out = jax.tree_util.tree_map(jax.block_until_ready, out)

    # Correctness check against a plain-JAX reference (per head).
    for head in heads:
        w1_t, b1, w2_t, b2 = model.params[head]
        ref = _reference_head(x, w1_t, b1, w2_t, b2)
        got = out[0][head]
        assert got.shape == (N, heads[head], H, W), (head, got.shape)
        err = float(jnp.max(jnp.abs(got - ref)))
        assert jnp.allclose(got, ref, atol=2e-3, rtol=2e-3), f"mismatch in {head}: {err}"

    print("KERNEL_OK")
</pallas_src>

<mosaic_0001>
module attributes {stable_mosaic.version = 11 : i64} {
  func.func @_fused_heads_kernel(%arg0: i32, %arg1: i32, %arg2: memref<1x16x1024xbf16, #tpu.memory_space<vmem>>, %arg3: memref<1x16x256xbf16, #tpu.memory_space<vmem>>, %arg4: memref<3x128x48xbf16, #tpu.memory_space<vmem>>, %arg5: memref<128x1xf32, #tpu.memory_space<vmem>>, %arg6: memref<8x128xbf16, #tpu.memory_space<vmem>>, %arg7: memref<8x1xf32, #tpu.memory_space<vmem>>, %arg8: memref<1x8x1024xf32, #tpu.memory_space<vmem>>, %arg9: memref<48x1536xbf16, #tpu.memory_space<vmem>>) attributes {dimension_semantics = [#tpu.dimension_semantics<parallel>, #tpu.dimension_semantics<parallel>], iteration_bounds = array<i64: 2, 2>, scalar_prefetch = 0 : i64, scratch_operands = 1 : i64, tpu.core_type = #tpu.core_type<tc>, window_params = [{transform_indices = @transform_0, window_bounds = array<i64: 1, 16, 1024>}, {transform_indices = @transform_1, window_bounds = array<i64: 1, 16, 256>}, {pipeline_mode = #tpu.pipeline_mode<synchronous>, transform_indices = @transform_2, window_bounds = array<i64: 3, 128, 48>}, {pipeline_mode = #tpu.pipeline_mode<synchronous>, transform_indices = @transform_3, window_bounds = array<i64: 128, 1>}, {pipeline_mode = #tpu.pipeline_mode<synchronous>, transform_indices = @transform_4, window_bounds = array<i64: 8, 128>}, {pipeline_mode = #tpu.pipeline_mode<synchronous>, transform_indices = @transform_5, window_bounds = array<i64: 8, 1>}, {transform_indices = @transform_6, window_bounds = array<i64: 1, 8, 1024>}]} {
    %c0 = arith.constant 0 : index
    %c0_0 = arith.constant 0 : index
    %c0_1 = arith.constant 0 : index
    %0 = vector.load %arg2[%c0, %c0_0, %c0_1] : memref<1x16x1024xbf16, #tpu.memory_space<vmem>>, vector<1x16x1024xbf16>
    %1 = vector.shape_cast %0 : vector<1x16x1024xbf16> to vector<16x1024xbf16>
    %c0_2 = arith.constant 0 : index
    %c129 = arith.constant 129 : index
    %2 = vector.load %arg9[%c0_2, %c129] : memref<48x1536xbf16, #tpu.memory_space<vmem>>, vector<16x1024xbf16>
    tpu.vector_store %arg9[%c0_2, %c129], %1 {strides = array<i32>} : memref<48x1536xbf16, #tpu.memory_space<vmem>>, vector<16x1024xbf16>,
    %c0_3 = arith.constant 0 : index
    %c0_4 = arith.constant 0 : index
    %c0_5 = arith.constant 0 : index
    %3 = vector.load %arg3[%c0_3, %c0_4, %c0_5] : memref<1x16x256xbf16, #tpu.memory_space<vmem>>, vector<1x16x256xbf16>
    %4 = vector.shape_cast %3 : vector<1x16x256xbf16> to vector<16x256xbf16>
    %c0_6 = arith.constant 0 : index
    %c1153 = arith.constant 1153 : index
    %5 = vector.load %arg9[%c0_6, %c1153] : memref<48x1536xbf16, #tpu.memory_space<vmem>>, vector<16x256xbf16>
    tpu.vector_store %arg9[%c0_6, %c1153], %4 {strides = array<i32>} : memref<48x1536xbf16, #tpu.memory_space<vmem>>, vector<16x256xbf16>,
    %c0_7 = arith.constant 0 : index
    %c0_8 = arith.constant 0 : index
    %c0_9 = arith.constant 0 : index
    %6 = vector.load %arg2[%c0_7, %c0_8, %c0_9] : memref<1x16x1024xbf16, #tpu.memory_space<vmem>>, vector<1x16x1024xbf16>
    %7 = vector.shape_cast %6 : vector<1x16x1024xbf16> to vector<16x1024xbf16>
    %c16 = arith.constant 16 : index
    %c128 = arith.constant 128 : index
    %8 = vector.load %arg9[%c16, %c128] : memref<48x1536xbf16, #tpu.memory_space<vmem>>, vector<16x1024xbf16>
    tpu.vector_store %arg9[%c16, %c128], %7 {strides = array<i32>} : memref<48x1536xbf16, #tpu.memory_space<vmem>>, vector<16x1024xbf16>,
    %c0_10 = arith.constant 0 : index
    %c0_11 = arith.constant 0 : index
    %c0_12 = arith.constant 0 : index
    %9 = vector.load %arg3[%c0_10, %c0_11, %c0_12] : memref<1x16x256xbf16, #tpu.memory_space<vmem>>, vector<1x16x256xbf16>
    %10 = vector.shape_cast %9 : vector<1x16x256xbf16> to vector<16x256xbf16>
    %c16_13 = arith.constant 16 : index
    %c1152 = arith.constant 1152 : index
    %11 = vector.load %arg9[%c16_13, %c1152] : memref<48x1536xbf16, #tpu.memory_space<vmem>>, vector<16x256xbf16>
    tpu.vector_store %arg9[%c16_13, %c1152], %10 {strides = array<i32>} : memref<48x1536xbf16, #tpu.memory_space<vmem>>, vector<16x256xbf16>,
    %c0_14 = arith.constant 0 : index
    %c0_15 = arith.constant 0 : index
    %c0_16 = arith.constant 0 : index
    %12 = vector.load %arg2[%c0_14, %c0_15, %c0_16] : memref<1x16x1024xbf16, #tpu.memory_space<vmem>>, vector<1x16x1024xbf16>
    %13 = vector.shape_cast %12 : vector<1x16x1024xbf16> to vector<16x1024xbf16>
    %c32 = arith.constant 32 : index
    %c127 = arith.constant 127 : index
    %14 = vector.load %arg9[%c32, %c127] : memref<48x1536xbf16, #tpu.memory_space<vmem>>, vector<16x1024xbf16>
    tpu.vector_store %arg9[%c32, %c127], %13 {strides = array<i32>} : memref<48x1536xbf16, #tpu.memory_space<vmem>>, vector<16x1024xbf16>,
    %c0_17 = arith.constant 0 : index
    %c0_18 = arith.constant 0 : index
    %c0_19 = arith.constant 0 : index
    %15 = vector.load %arg3[%c0_17, %c0_18, %c0_19] : memref<1x16x256xbf16, #tpu.memory_space<vmem>>, vector<1x16x256xbf16>
    %16 = vector.shape_cast %15 : vector<1x16x256xbf16> to vector<16x256xbf16>
    %c32_20 = arith.constant 32 : index
    %c1151 = arith.constant 1151 : index
    %17 = vector.load %arg9[%c32_20, %c1151] : memref<48x1536xbf16, #tpu.memory_space<vmem>>, vector<16x256xbf16>
    tpu.vector_store %arg9[%c32_20, %c1151], %16 {strides = array<i32>} : memref<48x1536xbf16, #tpu.memory_space<vmem>>, vector<16x256xbf16>,
    %cst = arith.constant 0.000000e+00 : f32
    %18 = vector.broadcast %cst : f32 to vector<128x1024xf32>
    %c0_21 = arith.constant 0 : index
    %c128_22 = arith.constant 128 : index
    %19 = vector.load %arg9[%c0_21, %c128_22] : memref<48x1536xbf16, #tpu.memory_space<vmem>>, vector<48x1024xbf16>
    %c0_23 = arith.constant 0 : index
    %c0_24 = arith.constant 0 : index
    %c0_25 = arith.constant 0 : index
    %20 = vector.load %arg4[%c0_23, %c0_24, %c0_25] : memref<3x128x48xbf16, #tpu.memory_space<vmem>>, vector<1x128x48xbf16>
    %21 = vector.shape_cast %20 : vector<1x128x48xbf16> to vector<128x48xbf16>
    %cst_26 = arith.constant dense<0.000000e+00> : vector<128x1024xf32>
    %22 = tpu.matmul %21, %19, %cst_26 {dimension_numbers = #tpu.dot_dimension_numbers<[1], [0], [0], [1], [0, 0, 1, 1], [], []>} : vector<128x48xbf16>, vector<48x1024xbf16>, vector<128x1024xf32> -> vector<128x1024xf32>
    %23 = arith.addf %18, %22 : vector<128x1024xf32>
    %c0_27 = arith.constant 0 : index
    %c256 = arith.constant 256 : index
    %24 = vector.load %arg9[%c0_27, %c256] : memref<48x1536xbf16, #tpu.memory_space<vmem>>, vector<48x1024xbf16>
    %c1 = arith.constant 1 : index
    %c0_28 = arith.constant 0 : index
    %c0_29 = arith.constant 0 : index
    %25 = vector.load %arg4[%c1, %c0_28, %c0_29] : memref<3x128x48xbf16, #tpu.memory_space<vmem>>, vector<1x128x48xbf16>
    %26 = vector.shape_cast %25 : vector<1x128x48xbf16> to vector<128x48xbf16>
    %cst_30 = arith.constant dense<0.000000e+00> : vector<128x1024xf32>
    %27 = tpu.matmul %26, %24, %cst_30 {dimension_numbers = #tpu.dot_dimension_numbers<[1], [0], [0], [1], [0, 0, 1, 1], [], []>} : vector<128x48xbf16>, vector<48x1024xbf16>, vector<128x1024xf32> -> vector<128x1024xf32>
    %28 = arith.addf %23, %27 : vector<128x1024xf32>
    %c0_31 = arith.constant 0 : index
    %c384 = arith.constant 384 : index
    %29 = vector.load %arg9[%c0_31, %c384] : memref<48x1536xbf16, #tpu.memory_space<vmem>>, vector<48x1024xbf16>
    %c2 = arith.constant 2 : index
    %c0_32 = arith.constant 0 : index
    %c0_33 = arith.constant 0 : index
    %30 = vector.load %arg4[%c2, %c0_32, %c0_33] : memref<3x128x48xbf16, #tpu.memory_space<vmem>>, vector<1x128x48xbf16>
    %31 = vector.shape_cast %30 : vector<1x128x48xbf16> to vector<128x48xbf16>
    %cst_34 = arith.constant dense<0.000000e+00> : vector<128x1024xf32>
    %32 = tpu.matmul %31, %29, %cst_34 {dimension_numbers = #tpu.dot_dimension_numbers<[1], [0], [0], [1], [0, 0, 1, 1], [], []>} : vector<128x48xbf16>, vector<48x1024xbf16>, vector<128x1024xf32> -> vector<128x1024xf32>
    %33 = arith.addf %28, %32 : vector<128x1024xf32>
    %c0_35 = arith.constant 0 : index
    %c0_36 = arith.constant 0 : index
    %34 = vector.load %arg5[%c0_35, %c0_36] : memref<128x1xf32, #tpu.memory_space<vmem>>, vector<128x1xf32>
    %35 = vector.broadcast %34 : vector<128x1xf32> to vector<128x1024xf32>
    %36 = arith.addf %33, %35 : vector<128x1024xf32>
    %cst_37 = arith.constant 0.000000e+00 : f32
    %37 = vector.broadcast %cst_37 : f32 to vector<128x1024xf32>
    %38 = arith.maximumf %36, %37 : vector<128x1024xf32>
    %39 = arith.truncf %38 : vector<128x1024xf32> to vector<128x1024xbf16>
    %c0_38 = arith.constant 0 : index
    %c0_39 = arith.constant 0 : index
    %40 = vector.load %arg6[%c0_38, %c0_39] : memref<8x128xbf16, #tpu.memory_space<vmem>>, vector<8x128xbf16>
    %cst_40 = arith.constant dense<0.000000e+00> : vector<8x1024xf32>
    %41 = tpu.matmul %40, %39, %cst_40 {dimension_numbers = #tpu.dot_dimension_numbers<[1], [0], [0], [1], [0, 0, 1, 1], [], []>} : vector<8x128xbf16>, vector<128x1024xbf16>, vector<8x1024xf32> -> vector<8x1024xf32>
    %c0_41 = arith.constant 0 : index
    %c0_42 = arith.constant 0 : index
    %42 = vector.load %arg7[%c0_41, %c0_42] : memref<8x1xf32, #tpu.memory_space<vmem>>, vector<8x1xf32>
    %43 = vector.broadcast %42 : vector<8x1xf32> to vector<8x1024xf32>
    %44 = arith.addf %41, %43 : vector<8x1024xf32>
    %c0_43 = arith.constant 0 : index
    %c0_44 = arith.constant 0 : index
    %c0_45 = arith.constant 0 : index
    %45 = vector.load %arg8[%c0_43, %c0_44, %c0_45] : memref<1x8x1024xf32, #tpu.memory_space<vmem>>, vector<1x8x1024xf32>
    %46 = vector.shape_cast %45 : vector<1x8x1024xf32> to vector<8x1024xf32>
    %47 = vector.shape_cast %44 : vector<8x1024xf32> to vector<1x8x1024xf32>
    tpu.vector_store %arg8[%c0_43, %c0_44, %c0_45], %47 {strides = array<i32>} : memref<1x8x1024xf32, #tpu.memory_space<vmem>>, vector<1x8x1024xf32>,
    return
  }
  func.func @transform_0(%arg0: i32, %arg1: i32) -> (i32, i32, i32) {
    %c0_i32 = arith.constant 0 : i32
    %c0_i32_0 = arith.constant 0 : i32
    return %arg0, %c0_i32, %arg1 : i32, i32, i32
  }
  func.func @transform_1(%arg0: i32, %arg1: i32) -> (i32, i32, i32) {
    %c1_i32 = arith.constant 1 : i32
    %0 = arith.addi %arg1, %c1_i32 : i32
    %c4_i32 = arith.constant 4 : i32
    %1 = arith.muli %0, %c4_i32 : i32
    %c0_i32 = arith.constant 0 : i32
    %c0_i32_0 = arith.constant 0 : i32
    return %arg0, %c0_i32, %1 : i32, i32, i32
  }
  func.func @transform_2(%arg0: i32, %arg1: i32) -> (i32, i32, i32) {
    %c0_i32 = arith.constant 0 : i32
    %c0_i32_0 = arith.constant 0 : i32
    %c0_i32_1 = arith.constant 0 : i32
    %c0_i32_2 = arith.constant 0 : i32
    return %c0_i32, %c0_i32_0, %c0_i32_1 : i32, i32, i32
  }
  func.func @transform_3(%arg0: i32, %arg1: i32) -> (i32, i32) {
    %c0_i32 = arith.constant 0 : i32
    %c0_i32_0 = arith.constant 0 : i32
    %c0_i32_1 = arith.constant 0 : i32
    return %c0_i32, %c0_i32_0 : i32, i32
  }
  func.func @transform_4(%arg0: i32, %arg1: i32) -> (i32, i32) {
    %c0_i32 = arith.constant 0 : i32
    %c0_i32_0 = arith.constant 0 : i32
    %c0_i32_1 = arith.constant 0 : i32
    return %c0_i32, %c0_i32_0 : i32, i32
  }
  func.func @transform_5(%arg0: i32, %arg1: i32) -> (i32, i32) {
    %c0_i32 = arith.constant 0 : i32
    %c0_i32_0 = arith.constant 0 : i32
    %c0_i32_1 = arith.constant 0 : i32
    return %c0_i32, %c0_i32_0 : i32, i32
  }
  func.func @transform_6(%arg0: i32, %arg1: i32) -> (i32, i32, i32) {
    %c0_i32 = arith.constant 0 : i32
    %c0_i32_0 = arith.constant 0 : i32
    return %arg0, %c0_i32, %arg1 : i32, i32, i32
  }
}

</mosaic_0001>

<bundles_post_ra>
// kernel: tpu_custom_call.1
= control target key start
LH: loop header
LB: loop body
LE: loop exit
PB: predicated region body
PF: predicated region fallthrough
CT: control target
= control target key end

     0   :  { %s5587_s0 = inlined_call_operand.vmem [shape: bf16[2,16,2304], index: 0, kind: input, shape index: {}]   ;;  %s5588_s1 = inlined_call_operand.hbm [shape: bf16[2,16,2304], index: 1, kind: input, shape index: {}]   ;;  %s5589_s2 = inlined_call_operand.vmem [shape: bf16[3,128,48], index: 2, kind: input, shape index: {}]   ;;  %s5590_s3 = inlined_call_operand.vmem [shape: f32[128,1], index: 3, kind: input, shape index: {}]   ;;  %s5591_s4 = inlined_call_operand.vmem [shape: bf16[8,128], index: 4, kind: input, shape index: {}]   ;;  %s5592_s5 = inlined_call_operand.vmem [shape: f32[8,1], index: 5, kind: input, shape index: {}]   ;;  %s5593_s6 = inlined_call_operand.hbm [shape: f32[2,8,2048], index: 6, kind: output, shape index: {}]  }
   0x1   :  { %5600 = sst [smem:[#allocation17_spill]] %s5593_s6 }
   0x2   :  { %11 = vsyncpa [#allocation5], 0 }
   0x3   :  { %13 = vsyncpa [#allocation5 + $0x1], 0 }
   0x4   :  { %14 = vsyncpa [#allocation6], 0 }
   0x5   :  { %16 = vsyncpa [#allocation6 + $0x1], 0  ;;  %s4639_s21 = smov 0   ;;  %s4641_s22 = smov 0  }
   0x6   :  { %s4643_s23 = smov 0   ;;  %s4645_s24 = smov 0  }
   0x7   :  { %s4647_s25 = smov 0   ;;  %s4649_s26 = smov 0  }
   0x8   :  { %s4651_s27 = smov 0   ;;  %s4653_s28 = smov 0  }
   0x9   :  { %s4655_s29 = smov 0   ;;  %s4657_s30 = smov 0  }
   0xa   :  { %s4659_s7 = smov 0  }
   0xb LB: > { %5601 = sst [smem:[#allocation10_spill]] %s4538_s21  ;;  %s31_s10 = sadd.s32 1, %s4570_s29  ;;  %s4578_s7 = sphi %s4659_s7, %s22_s7   ;;  %s4574_s30 = sphi %s4657_s30, %s5635_s30   ;;  %s4570_s29 = sphi %s4655_s29, %s5634_s29   ;;  %s4566_s28 = sphi %s4653_s28, %s5633_s28   ;;  %s4562_s27 = sphi %s4651_s27, %s5632_s27   ;;  %s4558_s26 = sphi %s4649_s26, %s5631_s26   ;;  %s4554_s25 = sphi %s4647_s25, %s5630_s25   ;;  %s4550_s24 = sphi %s4645_s24, %s5629_s24   ;;  %s4546_s23 = sphi %s4643_s23, %s5628_s23   ;;  %s4542_s22 = sphi %s4641_s22, %s5627_s22   ;;  %s4538_s21 = sphi %s4639_s21, %s5626_s21  }
   0xc   : > { %5602 = sst [smem:[#allocation11_spill]] %s4566_s28  ;;  %s34_s11 = sadd.s32 1, %s4574_s30 }
   0xd   : > { %p32_p0 = scmp.ge.s32.totalorder %s31_s10, 2  ;;  %s43_s12 = sadd.s32 1, %s4558_s26 }
   0xe   : > { %p50_p1 = scmp.ne.s32.totalorder %s4558_s26, %s4554_s25  ;;  %p51_p2 = scmp.eq.s32.totalorder %s4578_s7, 0 }
   0xf   : > { %s5637_s10 = smov (%p32_p0, %s31_s10), 0  ;;  %s5639_s11 = smov (!%p32_p0, %s34_s11), %s4574_s30 }
  0x10   : > { %5603 = sst [smem:[#allocation12_spill]] %s5637_s10  ;;  %s39_s13 = ssub.s32 %s4570_s29, %s5637_s10 }
  0x11   : > { %p4712_p3 = por %p51_p2, %p50_p1  ;;  %p36_p4 = scmp.ge.s32.totalorder %s5639_s11, 2 }
  0x12   : > { %s3834_s15 = sshll.u32 %s4570_s29, 2  ;;  %s3836_s17 = sshll.u32 %s5637_s10, 2 }
  0x13   : > { %s3835_s16 = sadd.s32 4, %s3834_s15  ;;  %s5641_s11 = smov (%p36_p4, %s5639_s11), 0 }
  0x14   : > { %5605 = sst [smem:[#allocation13_spill]] %s5641_s11  ;;  %s3837_s18 = sadd.s32 4, %s3836_s17 }
  0x15   : > { %s75_s19 = sadd.s32 1, %s4550_s24  ;;  %s38_s20 = ssub.s32 %s4574_s30, %s5641_s11 }
  0x16   : > { %s71_s9 = ssub.s32 %s3835_s16, %s3837_s18  ;;  %s40_s8 = sor.u32 %s39_s13, %s38_s20 }
  0x17   : > { %s72_s6 = sor.u32 %s71_s9, %s38_s20  ;;  %p41_p5 = scmp.eq.s32.totalorder %s40_s8, 0 }
  0x18   : > { %p73_p6 = scmp.eq.s32.totalorder %s72_s6, 0  ;;  %p82_p7 = scmp.ne.s32.totalorder %s4550_s24, %s4546_s23 }
  0x19   : > { %p88_p8 = scmp.ne.s32.totalorder %s4546_s23, %s4542_s22  ;;  %s5609_s17 = sadd.s32 4294967295, %s4578_s7  }
  0x1a   : > { %s4728_s15 = scalar_select %p41_p5, %s4558_s26, %s43_s12  }
  0x1b   : > { %s4731_s10 = scalar_select %p73_p6, %s4550_s24, %s75_s19  }
  0x1c   : > { %5606 = sst [smem:[#allocation14_spill]] %s4728_s15  ;;  %p4735_p9 = por %p82_p7, %p51_p2 }
  0x1d   : > { %5607 = sst [smem:[#allocation15_spill]] %s4731_s10  ;;  %p89_p10 = scmp.eq.s32.totalorder %s5609_s17, 0 }
  0x1e   : > { %s5610_s11 = smov %s5609_s17  ;;  %p203_p12 = scmp.ne.s32.totalorder %s4554_s25, %s4538_s21 }
  0x1f   : > { %p198_p11 = scmp.eq.s32.totalorder %s5610_s11, 3  ;;  %p4745_p13 = por %p89_p10, %p88_p8 }
  0x20   : > { %s5612_s6 = sadd.s32 4294967294, %s4578_s7   ;;  %p3611_p5 = scmp.ge.s32.totalorder %s4578_s7, 4 }
  0x21   : > { %p204_p0 = scmp.eq.s32.totalorder %s5612_s6, 3  ;;  %p4754_p4 = por %p198_p11, %p50_p1 }
  0x22   : > { %232 = sbr.rel (%p3611_p5) target bundleno = 89 (0x59), region = 32 }
  0x23   : > { %s5613_s22 = scalar_select %p4754_p4, 1, 0 }
  0x24   : > { %p4758_p2 = por %p204_p0, %p203_p12 }
  0x26   : > { %s5614_s8 = scalar_select %p4758_p2, 1, 0 }
  0x28   : > { %5615 = sst [smem:[#allocation16_spill]] %s5614_s8 }
  0x29   : > { %235 = sbr.rel (!%p4712_p3) target bundleno = 59 (0x3b), region = 36  ;;  %s237_s11 = sand.u32 (%p4712_p3), 1, %s4558_s26  }
  0x2a   : > { %s3613_s12 = sshll.u32 (%p4712_p3), %s4570_s29, 3  ;;  %s4767_s13 = sshll.u32 (%p4712_p3), %s237_s11, 6 }
  0x2b   : > { %s4098_s16 = smul.u32 (%p4712_p3), 36, %s4574_s30  ;;  %s239_s15 = scalar_lea.vmem (%p4712_p3), [#allocation3], %s4767_s13  }
  0x2c   : > { %s4580_s10 = smov (%p4712_p3), %s239_s15   ;;  %s4588_s14 = smov (%p4712_p3), 0  }
  0x2d   : > { %s247_s18 = sadd.s32 (%p4712_p3), %s4098_s16, %s3613_s12  ;;  %s4592_s21 = smov (%p4712_p3), 0  }
  0x2e   : > { %s3616_s19 = sshll.u32 (%p4712_p3), %s247_s18, 2 }
  0x2f   : > { %s249_s6 = scalar_lea.vmem (%p4712_p3), %s5587_s0, %s3616_s19  }
  0x30   : > { %s4584_s8 = smov %s249_s6  }
  0x31 LB: >> { %v447_v0 = vld [vmem:[%s4586_s8] sm:$0xff]  ;;  %v449_v1 = vld [vmem:[%s4586_s8 + $0x48] sm:$0xff]  ;;  %s451_s11 = sadd.s32 1, %s4590_s14  ;;  %s441_s21 = sadd.s32 1, %s4594_s21   ;;  %s4594_s21 = sphi %s4592_s21, %s441_s21   ;;  %s4590_s14 = sphi %s4588_s14, %s4589_s14   ;;  %s4586_s8 = sphi %s4584_s8, %s456_s8   ;;  %s4582_s10 = sphi %s4580_s10, %s457_s10  }
  0x32   : >> { %448 = vst [vmem:[%s4582_s10] sm:$0xff] %v447_v0  ;;  %450 = vst [vmem:[%s4582_s10 + $0x20] sm:$0xff] %v449_v1  ;;  %p452_p1 = scmp.ge.s32.totalorder %s451_s11, 4  ;;  %p440_p3 = scmp.ge.s32.totalorder %s441_s21, 4 }
  0x34   : >> { %s5643_s11 = smov (%p452_p1, %s451_s11), 0  ;;  %443 = sbr.rel (!%p440_p3) target bundleno = 49 (0x31), region = 194 }
  0x35   : >> { %s3627_s12 = sshll.u32 %s5643_s11, 3  ;;  %s4589_s14 = smov %s5643_s11  }
  0x36   : >> { %s456_s8 = scalar_lea.vmem %s249_s6, %s3627_s12   ;;  %s457_s10 = scalar_lea.vmem %s239_s15, %s3627_s12 [#allocation3]  }
  0x3b PF: > { %s662_s13 = sand.u32 1, %s4550_s24   ;;  %s3640_s16 = sshll.u32 %s4570_s29, 3 }
  0x3c   : > { %s3639_s18 = sshll.u32 %s662_s13, 4  ;;  %s3472_s19 = smul.u32 36, %s4574_s30 }
  0x3d   : > { %s666_s20 = scalar_lea.vmem [#allocation4], %s3639_s18  ;;  %s4784_s15 = scalar_lea.sflag [#allocation5], %s662_s13 }
  0x3e   : > { %s677_s17 = sshll.u32 %s666_s20, 4  ;;  %s3473_s14 = sadd.s32 %s3640_s16, %s3472_s19  ;;  %s4777_s17 = int_to_ptr.vmem [resolvable:$true] %s677_s17 }
  0x3f   : > { %s3641_s12 = sshll.u32 %s3473_s14, 6  ;;  %s4365_s19 = scalar_lea.hbm %s5588_s1, 4608 }
  0x40   : > { %s3475_s21 = scalar_lea.hbm %s5588_s1, %s3641_s12 }
  0x41   : > { %s4782_s11 = scalar_lea.hbm %s3475_s21, 512  ;;  %s4389_s6 = scalar_lea.hbm %s3475_s21, 768 }
  0x42   : > { %p4362_p6 = scmp.ne.s32.totalorder %s4782_s11, %s4389_s6  ;;  %p4366_p10 = scmp.lt.u32.totalorder %s4782_s11, %s5588_s1 }
  0x43   : > { %p4367_p11 = scmp.lt.u32.totalorder %s4365_s19, %s4389_s6  ;;  %p4369_p0 = scmp.lt.u32.totalorder %s4389_s6, %s4782_s11 }
  0x44   : > { %p4363_p7 = pnand %p4362_p6, %p4735_p9 }
  0x45   : > { %p4368_p12 = por %p4367_p11, %p4366_p10 }
  0x46   : > { %p4364_p8 = pneg %p4363_p7 }
  0x47   : > { %p4370_p5 = por %p4369_p0, %p4368_p12 }
  0x49   : > { %p4371_p1 = pnand %p4370_p5, %p4364_p8 }
  0x4b   : > { %4374 = shalt.err (!%p4371_p1)
}
  0x4c   : > { %s4375_s13 = scalar_lea.vmem %s4777_s17, 256  ;;  %s4596_s12 = smov [#allocation4]  }
  0x4d   : > { %p4376_p3 = scmp.ne.s32.totalorder %s4777_s17, %s4375_s13  ;;  %s4379_s10 = sshll.u32 %s4596_s12, 4  ;;  %s4380_s10 = int_to_ptr.vmem [resolvable:$false] %s4379_s10 }
  0x4e   : > { %s4381_s8 = scalar_lea.vmem %s4380_s10, 512  ;;  %p4382_p2 = scmp.lt.s32.totalorder %s4777_s17, %s4380_s10 }
  0x4f   : > { %p4377_p6 = pnand %p4376_p3, %p4735_p9  ;;  %p4383_p4 = scmp.lt.s32.totalorder %s4381_s8, %s4375_s13 }
  0x51   : > { %p4378_p7 = pneg %p4377_p6  ;;  %p4384_p10 = por %p4383_p4, %p4382_p2 }
  0x53   : > { %p4385_p11 = pnand %p4384_p10, %p4378_p7 }
  0x55   : > { %4388 = shalt.err (!%p4385_p11)
}
  0x56   : > { %s4597_s21 = smov 1152   ;;  %s4598_s6 = smov 128  }
  0x57   : > { %s4599_s16 = smov 8  }
  0x58   : > { %4099 = dma.hbm_to_vmem [thread:$0]  (%p4735_p9), %s4782_s11, 256, %s4777_s17, %s4784_s15, %s4597_s21, %s4598_s6, %s4599_s16  }
  0x59 PF: > { %p3642_p8 = scmp.ge.s32.totalorder %s4578_s7, 1  ;;  %p685_p12 = scmp.lt.s32.totalorder %s4578_s7, 5 }
  0x5b   : > { %p686_p0 = pnand %p3642_p8, %p685_p12 }
  0x5c   : > { %s692_s18 = sand.u32 (!%p686_p0), 1, %s4554_s25   ;;  %s698_s19 = sand.u32 (!%p686_p0), 1, %s4546_s23  }
  0x5d   : > { %689 = sbr.rel (%p686_p0) target bundleno = 1071 (0x42f), region = 106  ;;  %s4813_s20 = sshll.u32 (!%p686_p0), %s692_s18, 6 }
  0x5e   : > { %s3644_s14 = sshll.u32 (!%p686_p0), %s698_s19, 4  ;;  %s694_s28 = scalar_lea.vmem (!%p686_p0), [#allocation3], %s4813_s20 }
  0x5f   : > { %s699_s17 = scalar_lea.sflag (!%p686_p0), [#allocation5], %s698_s19  ;;  %s702_s11 = scalar_lea.vmem (!%p686_p0), [#allocation4], %s3644_s14 }
  0x64   : > { %4527 = dma.done.wait (%p4745_p13), %s699_s17, 256  }
  0x65   : > { %4529 = vsyncadd (%p4745_p13), %s699_s17, 4294967040  ;;  %v746_v2 = vld [vmem:[%s694_s28 + $0x8] sm:$0xff]  ;;  %v745_v4 = vld [vmem:[%s694_s28] sm:$0xff]  ;;  %s4600_s9 = smov 1   ;;  %v4601_v20 = vmov 0   ;;  %s4602_s15 = smov 127  }
  0x66   : > { %v750_v3 = vld [vmem:[%s694_s28 + $0x28] sm:$0xff]  ;;  %v749_v7 = vld [vmem:[%s694_s28 + $0x20] sm:$0xff]  ;;  %v747_v8 = vld [vmem:[%s694_s28 + $0x10] sm:$0xff]  ;;  %1182 = vmatprep.mubr.bf16.mxu0 %v4601_v20  ;;  %1295 = vmatprep.mubr.bf16.mxu1 %v4601_v20  ;;  %vm801_vm0 = vcmask 7168   ;;  %vm818_vm1 = vcmask 1047560   ;;  %vm976_vm2 = vcmask 1039360  }
  0x67   : > { %v4820_v5 = vcombine.high %v746_v2, %v750_v3  ;;  %v4822_v6 = vcombine.low %v746_v2, %v750_v3  ;;  %v751_v9 = vld [vmem:[%s694_s28 + $0x30] sm:$0xff]  ;;  %v4824_v10 = vcombine.high %v745_v4, %v749_v7  ;;  %v4826_v11 = vcombine.low %v745_v4, %v749_v7  ;;  %v748_v14 = vld [vmem:[%s694_s28 + $0x18] sm:$0xff]  ;;  %4332 = vset.pattern.permute.xlu0 %v4601_v20  ;;  %v4898_v39 = vld [vmem:[%s5589_s2 + $0x40] sm:$0xff]   ;;  %s5616_s13 = sld [smem:[#allocation11_spill]]  ;;  %s5507_s12 = scalar_lea.vmem [#allocation7], %s4813_s20 }
  0x68   : > { %v4828_v12 = vcombine.low %v747_v8, %v751_v9  ;;  %v4830_v13 = vcombine.high %v747_v8, %v751_v9  ;;  %v752_v15 = vld [vmem:[%s694_s28 + $0x38] sm:$0xff]  ;;  %4333 = vset.pattern.permute.xlu1 %v4601_v20  ;;  %vm1125_vm3 = vcmask 392192   ;;  %v4925_v47 = vld [vmem:[%s5589_s2 + $0x48] sm:$0xff]   ;;  %vm993_vm4 = vcmask 1048568   ;;  %v4953_v56 = vld [vmem:[%s5589_s2 + $0x50] sm:$0xff]   ;;  %s3829_s10 = sshll.u32 %s4562_s27, 3 }
  0x69   : > { %791 = vrot.lane.b32.xlu1 %v4820_v5, %s4600_s9  ;;  %v4833_v16 = vcombine.low %v748_v14, %v752_v15  ;;  %v4835_v17 = vld [vmem:[%s702_s11] ss:$8 sps:$4 sm:$0xff]   ;;  %v4837_v18 = vcombine.high %v748_v14, %v752_v15  ;;  %v4839_v19 = vld [vmem:[%s702_s11 + $0x4] ss:$8 sps:$4 sm:$0xff]   ;;  %787 = vrot.lane.b32.xlu0 %v4824_v10, %s4600_s9  ;;  %s3415_s6 = sshll.u32 %s5507_s12, 4  ;;  %s5617_s19 = sld [smem:[#allocation17_spill]]  ;;  %s5522_s6 = int_to_ptr.vmem [resolvable:$true] %s3415_s6 }
  0x6a   : > { %v4340_v62 = vld [vmem:[%s5589_s2 + $0x58] sm:$0xff]   ;;  %v4341_v63 = vld [vmem:[%s5589_s2 + $0x60] sm:$0xff]   ;;  %v4342_v0 = vld [vmem:[%s5589_s2 + $0x68] sm:$0xff]   ;;  %s3399_s28 = scalar_lea.sflag [#allocation6], %s692_s18  ;;  %s4390_s17 = scalar_lea.vmem %s5522_s6, 1024 }
  0x6b   : > { %v4343_v1 = vld [vmem:[%s5589_s2 + $0x70] sm:$0xff]   ;;  %v4344_v2 = vld [vmem:[%s5589_s2 + $0x78] sm:$0xff]   ;;  %v4345_v4 = vld [vmem:[%s5589_s2] sm:$0xff]   ;;  %p4391_p9 = scmp.ne.s32.totalorder %s5522_s6, %s4390_s17  ;;  %p5618_p13 = scmp.ne.s32.totalorder %s5613_s22, 0 }
  0x6c   : > { %v4346_v7 = vld [vmem:[%s5589_s2 + $0x8] sm:$0xff]   ;;  %v4347_v8 = vld [vmem:[%s5589_s2 + $0x10] sm:$0xff]   ;;  %v4348_v9 = vld [vmem:[%s5589_s2 + $0x18] sm:$0xff]   ;;  %s4603_s11 = smov [#allocation7]  }
  0x6d   : > { %793 = vrot.lane.b32.xlu1 %v4828_v12, %s4600_s9  ;;  %789 = vrot.lane.b32.xlu0 %v4822_v6, %s4600_s9  ;;  %v5118_v14 = vld [vmem:[%s5589_s2 + $0x30] sm:$0xff]   ;;  %v5129_v15 = vld [vmem:[%s5589_s2 + $0x38] sm:$0xff]   ;;  %s3830_s8 = sshll.u32 %s5616_s13, 4  ;;  %p4392_p4 = pnand %p4391_p9, %p5618_p13 }
  0x6e   : > { %s3411_s21 = sadd.s32 %s3830_s8, %s3829_s10 }
  0x6f   : > { %s3831_s20 = sshll.u32 %s3411_s21, 7  ;;  %p4393_p2 = pneg %p4392_p4 }
  0x70   : > { %s5520_s14 = scalar_lea.hbm %s5617_s19, %s3831_s20 }
  0x71   : > { %964 = vrot.lane.b32.xlu1 %v4822_v6, %s4602_s15  ;;  %785 = vrot.lane.b32.xlu0 %v4826_v11, %s4600_s9 }
  0x75   : > { %968 = vrot.lane.b32.xlu1 %v4828_v12, %s4602_s15  ;;  %966 = vrot.lane.b32.xlu0 %v4820_v5, %s4602_s15 }
  0x79   : > { %962 = vrot.lane.b32.xlu1 %v4824_v10, %s4602_s15  ;;  %970 = vrot.lane.b32.xlu0 %v4830_v13, %s4602_s15 }
  0x7d   : > { %797 = vrot.lane.b32.xlu1 %v4833_v16, %s4600_s9  ;;  %795 = vrot.lane.b32.xlu0 %v4830_v13, %s4600_s9 }
  0x81   : > { %839 = vrot.lane.b32.xlu1 %v4835_v17, %s4600_s9  ;;  %799 = vrot.lane.b32.xlu0 %v4837_v18, %s4600_s9 }
  0x85   : > { %974 = vrot.lane.b32.xlu1 %v4837_v18, %s4602_s15  ;;  %972 = vrot.lane.b32.xlu0 %v4833_v16, %s4602_s15 }
  0x89   : > { %1016 = vrot.lane.b32.xlu1 %v4839_v19, %s4602_s15  ;;  %1014 = vrot.lane.b32.xlu0 %v4835_v17, %s4602_s15 }
  0x8d   : > { %841 = vrot.lane.b32.xlu1 %v4839_v19, %s4600_s9  ;;  %960 = vrot.lane.b32.xlu0 %v4826_v11, %s4602_s15  ;;  %s4394_s9 = sshll.u32 %s4603_s11, 4  ;;  %s4395_s9 = int_to_ptr.vmem [resolvable:$false] %s4394_s9 }
  0x8e   : > { %s4396_s15 = scalar_lea.vmem %s4395_s9, 2048  ;;  %p4397_p5 = scmp.lt.s32.totalorder %s5522_s6, %s4395_s9 }
  0x8f   : > { %p4398_p1 = scmp.lt.s32.totalorder %s4396_s15, %s4390_s17 }
  0x91   : > { %p4399_p3 = por %p4398_p1, %p4397_p5 }
  0x93   : > { %p4400_p6 = pnand %p4399_p3, %p4393_p2 }
  0xdb   : > { %v792_v21 = vpop.permute.xlu1 %791  ;;  %v788_v22 = vpop.permute.xlu0 %787 }
  0xdf   : > { %v794_v23 = vpop.permute.xlu1 %793  ;;  %v790_v25 = vpop.permute.xlu0 %789 }
  0xe0   : > { %v4865_v24 = vsel %vm801_vm0, %v792_v21, %v794_v23  ;;  %v4868_v26 = vsel %vm801_vm0, %v788_v22, %v790_v25  ;;  %v4871_v27 = vsel %vm801_vm0, %v790_v25, %v792_v21  ;;  %v2807_v21 = vld [vmem:[%s5590_s3 + $0x20] sm:$0xff]  ;;  %v2810_v25 = vld [vmem:[%s5590_s3 + $0x38] sm:$0xff] }
  0xe1   : > { %1263 = vmatprep.subr.bf16.mxu1 %v4865_v24  ;;  %1150 = vmatprep.subr.bf16.mxu0 %v4868_v26 }
  0xe2   : > { %1264 = vmatpush1.bf16.msra.mxu1 %v4871_v27 }
  0xe3   : > { %v965_v28 = vpop.permute.xlu1 %964  ;;  %1265 = vmatprep.subr.bf16.mxu1 %v4828_v12  ;;  %v786_v29 = vpop.permute.xlu0 %785 }
  0xe4   : > { %v802_v30 = vsel %vm801_vm0, %v786_v29, %v788_v22  ;;  %819 = vst.msk [vmem:[#allocation2 + $0x8] sm:$0xff] %vm818_vm1, %v786_v29  ;;  %v2808_v22 = vld [vmem:[%s5590_s3 + $0x28] sm:$0xff]  ;;  %v2814_v29 = vld [vmem:[%s5590_s3 + $0x58] sm:$0xff] }
  0xe5   : > { %1151 = vmatpush1.bf16.msra.mxu0 %v802_v30 }
  0xe6   : > { %1266 = vmatpush1.bf16.msra.mxu1 %v4820_v5  ;;  %1152 = vmatprep.subr.bf16.mxu0 %v4822_v6 }
  0xe7   : > { %v969_v31 = vpop.permute.xlu1 %968  ;;  %v967_v32 = vpop.permute.xlu0 %966 }
  0xe8   : > { %v4882_v33 = vsel %vm976_vm2, %v965_v28, %v967_v32  ;;  %v4885_v34 = vsel %vm976_vm2, %v967_v32, %v969_v31  ;;  %v3220_v32 = vld [vmem:[%s5592_s5] sm:$0xff] }
  0xe9   : > { %1153 = vmatpush1.bf16.msra.mxu0 %v4824_v10 }
  0xea   : > { %1154 = vmatprep.subr.bf16.mxu0 %v4882_v33 }
  0xeb   : > { %v963_v35 = vpop.permute.xlu1 %962  ;;  %v971_v37 = vpop.permute.xlu0 %970  ;;  %v1025_v3 = vld [vmem:[#allocation2 + $0x8] sm:$0xff] }
  0xec   : > { %v4890_v36 = vsel %vm976_vm2, %v963_v35, %v965_v28  ;;  %v4893_v38 = vsel %vm976_vm2, %v969_v31, %v971_v37  ;;  %v2815_v28 = vld [vmem:[%s5590_s3 + $0x60] sm:$0xff]  ;;  %v2816_v31 = vld [vmem:[%s5590_s3 + $0x68] sm:$0xff] }
  0xed   : > { %1155 = vmatpush1.bf16.msra.mxu0 %v4890_v36  ;;  %1267 = vmatprep.subr.bf16.mxu1 %v4893_v38 }
  0xee   : > { %1268 = vmatpush1.bf16.msra.mxu1 %v4885_v34 }
  0xef   : > { %v798_v40 = vpop.permute.xlu1 %797  ;;  %v796_v41 = vpop.permute.xlu0 %795 }
  0xf0   : > { %v4904_v42 = vsel %vm801_vm0, %v794_v23, %v796_v41  ;;  %v4907_v43 = vsel %vm801_vm0, %v796_v41, %v798_v40  ;;  %3700 = vmatmul.mubr.msk.bf16.vlgmr.msra.gmra.mrb[0].mxu0 %vm1125_vm3, %v4898_v39  ;;  %v2809_v23 = vld [vmem:[%s5590_s3 + $0x30] sm:$0xff] }
  0xf1   : > { %3708 = vmatmul.mubr.msk.bf16.vlgmr.msra.gmra.mrb[0].mxu1 %vm1125_vm3, %v4898_v39  ;;  %1376 = vmatprep.subr.bf16.mxu0 %v4907_v43 }
  0xf2   : > { %1377 = vmatpush1.bf16.msra.mxu0 %v4904_v42  ;;  %1192 = vmatprep.mubr.bf16.mxu0 %v4601_v20 }
  0xf3   : > { %v840_v44 = vpop.permute.xlu1 %839  ;;  %v800_v45 = vpop.permute.xlu0 %799  ;;  %1378 = vmatprep.subr.bf16.mxu0 %v4833_v16  ;;  %1305 = vmatprep.mubr.bf16.mxu1 %v4601_v20 }
  0xf4   : > { %v4919_v46 = vsel %vm801_vm0, %v798_v40, %v800_v45  ;;  %828 = vst.msk [vmem:[#allocation2 + $0x48] sm:$0xff] %vm801_vm0, %v800_v45 }
  0xf5   : > { %847 = vst.msk [vmem:[#allocation2 + $0x48] sm:$0xff] %vm818_vm1, %v840_v44 }
  0xf6   : > { %1379 = vmatpush1.bf16.msra.mxu0 %v4830_v13 }
  0xf7   : > { %v975_v48 = vpop.permute.xlu1 %974  ;;  %v973_v49 = vpop.permute.xlu0 %972 }
  0xf8   : > { %1003 = vst.msk [vmem:[#allocation2 + $0x100] sm:$0xff] %vm976_vm2, %v975_v48  ;;  %v4931_v50 = vsel %vm976_vm2, %v971_v37, %v973_v49  ;;  %v4934_v51 = vsel %vm976_vm2, %v973_v49, %v975_v48  ;;  %3701 = vmatmul.mubr.msk.bf16.gmra.mrb[4].mxu0 %vm1125_vm3, %v4925_v47  ;;  %v4359_v37 = vld [vmem:[%s5589_s2 + $0xb0] sm:$0xff]  }
  0xf9   : > { %3709 = vmatmul.mubr.msk.bf16.gmra.mrb[4].mxu1 %vm1125_vm3, %v4925_v47  ;;  %1380 = vmatprep.subr.bf16.mxu0 %v4934_v51 }
  0xfa   : > { %1381 = vmatpush1.bf16.msra.mxu0 %v4931_v50  ;;  %1202 = vmatprep.mubr.bf16.mxu0 %v4601_v20 }
  0xfb   : > { %v1017_v52 = vpop.permute.xlu1 %1016  ;;  %v1015_v53 = vpop.permute.xlu0 %1014  ;;  %1666 = vmatprep.subr.bf16.mxu0 %v802_v30  ;;  %1315 = vmatprep.mubr.bf16.mxu1 %v4601_v20  ;;  %v2817_v30 = vld [vmem:[%s5590_s3 + $0x70] sm:$0xff] }
  0xfc   : > { %1024 = vst.msk [vmem:[#allocation2 + $0x110] sm:$0xff] %vm976_vm2, %v1017_v52  ;;  %v4946_v54 = vsel %vm976_vm2, %v1015_v53, %v1017_v52  ;;  %v4948_v55 = vld [vmem:[#allocation2 + $0x48] sm:$0xff] }
  0xfd   : > { %1022 = vst.msk [vmem:[#allocation2 + $0x100] sm:$0xff] %vm993_vm4, %v1015_v53  ;;  %1489 = vmatprep.subr.bf16.mxu1 %v4948_v55 }
  0xfe   : > { %1490 = vmatpush1.bf16.msra.mxu1 %v4919_v46 }
  0xff   : > { %v842_v57 = vpop.permute.xlu1 %841  ;;  %v961_v59 = vpop.permute.xlu0 %960  ;;  %1491 = vmatprep.subr.bf16.mxu1 %v4835_v17 }
 0x100   : > { %v4958_v58 = vsel %vm801_vm0, %v840_v44, %v842_v57  ;;  %v977_v60 = vsel %vm976_vm2, %v961_v59, %v963_v35  ;;  %3702 = vmatmul.mubr.msk.bf16.gmra.mrb[8].mxu0 %vm1125_vm3, %v4953_v56  ;;  %v4354_v35 = vld [vmem:[%s5589_s2 + $0x88] sm:$0xff]  }
 0x101   : > { %3710 = vmatmul.mubr.msk.bf16.gmra.mrb[8].mxu1 %vm1125_vm3, %v4953_v56  ;;  %1212 = vmatprep.mubr.bf16.mxu0 %v4601_v20 }
 0x102   : > { %1492 = vmatpush1.bf16.msra.mxu1 %v4837_v18  ;;  %1325 = vmatprep.mubr.bf16.mxu1 %v4601_v20 }
 0x103   : > { %1493 = vmatprep.subr.bf16.mxu1 %v4946_v54 }
 0x104   : > { %v4970_v61 = vld [vmem:[#allocation2 + $0x100] sm:$0xff] }
 0x106   : > { %1494 = vmatpush1.bf16.msra.mxu1 %v4970_v61 }
 0x107   : > { %1779 = vmatprep.subr.bf16.mxu1 %v4871_v27 }
 0x108   : > { %3703 = vmatmul.mubr.msk.bf16.gmra.mrb[12].mxu0 %vm1125_vm3, %v4340_v62 }
 0x109   : > { %3711 = vmatmul.mubr.msk.bf16.gmra.mrb[12].mxu1 %vm1125_vm3, %v4340_v62  ;;  %1222 = vmatprep.mubr.bf16.mxu0 %v4601_v20 }
 0x10a   : > { %1335 = vmatprep.mubr.bf16.mxu1 %v4601_v20 }
 0x110   : > { %3704 = vmatmul.mubr.msk.bf16.gmra.mrb[16].mxu0 %vm1125_vm3, %v4341_v63 }
 0x111   : > { %3712 = vmatmul.mubr.msk.bf16.gmra.mrb[16].mxu1 %vm1125_vm3, %v4341_v63  ;;  %1232 = vmatprep.mubr.bf16.mxu0 %v4601_v20 }
 0x112   : > { %1345 = vmatprep.mubr.bf16.mxu1 %v4601_v20 }
 0x118   : > { %3705 = vmatmul.mubr.msk.bf16.gmra.mrb[20].mxu0 %vm1125_vm3, %v4342_v0 }
 0x119   : > { %3713 = vmatmul.mubr.msk.bf16.gmra.mrb[20].mxu1 %vm1125_vm3, %v4342_v0  ;;  %1242 = vmatprep.mubr.bf16.mxu0 %v4601_v20 }
 0x11a   : > { %1355 = vmatprep.mubr.bf16.mxu1 %v4601_v20 }
 0x120   : > { %3706 = vmatmul.mubr.msk.bf16.gmra.mrb[24].mxu0 %vm1125_vm3, %v4343_v1 }
 0x121   : > { %3714 = vmatmul.mubr.msk.bf16.gmra.mrb[24].mxu1 %vm1125_vm3, %v4343_v1  ;;  %1252 = vmatprep.mubr.bf16.mxu0 %v4601_v20 }
 0x122   : > { %1365 = vmatprep.mubr.bf16.mxu1 %v4601_v20 }
 0x128   : > { %3707 = vmatmul.mubr.msk.bf16.gmra.mrb[28].mxu0 %vm1125_vm3, %v4344_v2 }
 0x129   : > { %3715 = vmatmul.mubr.msk.bf16.gmra.mrb[28].mxu1 %vm1125_vm3, %v4344_v2  ;;  %1408 = vmatprep.mubr.bf16.mxu0 %v4601_v20 }
 0x12a   : > { %1521 = vmatprep.mubr.bf16.mxu1 %v4601_v20 }
 0x130   : > { %3716 = vmatmul.mubr.msk.bf16.vlgmr.msra.gmra.mrb[32].mxu0 %vm1125_vm3, %v4898_v39 }
 0x131   : > { %1667 = vmatpush1.bf16.msra.mxu0 %v1025_v3  ;;  %3724 = vmatmul.mubr.msk.bf16.vlgmr.msra.gmra.mrb[32].mxu1 %vm1125_vm3, %v4898_v39 }
 0x132   : > { %1780 = vmatpush1.bf16.msra.mxu1 %v4868_v26  ;;  %1668 = vmatprep.subr.bf16.mxu0 %v4824_v10  ;;  %v4349_v10 = vld [vmem:[%s5589_s2 + $0x20] sm:$0xff]  }
 0x133   : > { %1781 = vmatprep.subr.bf16.mxu1 %v4820_v5  ;;  %1418 = vmatprep.mubr.bf16.mxu0 %v4601_v20 }
 0x134   : > { %1531 = vmatprep.mubr.bf16.mxu1 %v4601_v20 }
 0x135   : > { %1669 = vmatpush1.bf16.msra.mxu0 %v4826_v11  ;;  %v5107_v11 = vld [vmem:[%s5589_s2 + $0x28] sm:$0xff]  }
 0x136   : > { %1670 = vmatprep.subr.bf16.mxu0 %v4890_v36  ;;  %1782 = vmatpush1.bf16.msra.mxu1 %v4822_v6  ;;  %v2141_v36 = vld [vmem:[#allocation2 + $0x110] sm:$0xff] }
 0x137   : > { %1783 = vmatprep.subr.bf16.mxu1 %v4885_v34 }
 0x138   : > { %3717 = vmatmul.mubr.msk.bf16.gmra.mrb[36].mxu0 %vm1125_vm3, %v4925_v47 }
 0x139   : > { %1671 = vmatpush1.bf16.msra.mxu0 %v977_v60  ;;  %3725 = vmatmul.mubr.msk.bf16.gmra.mrb[36].mxu1 %vm1125_vm3, %v4925_v47 }
 0x13a   : > { %1784 = vmatpush1.bf16.msra.mxu1 %v4882_v33  ;;  %1892 = vmatprep.subr.bf16.mxu0 %v4904_v42 }
 0x13b   : > { %2005 = vmatprep.subr.bf16.mxu1 %v4919_v46  ;;  %1428 = vmatprep.mubr.bf16.mxu0 %v4601_v20 }
 0x13c   : > { %1541 = vmatprep.mubr.bf16.mxu1 %v4601_v20 }
 0x140   : > { %3718 = vmatmul.mubr.msk.bf16.gmra.mrb[40].mxu0 %vm1125_vm3, %v4953_v56 }
 0x141   : > { %3726 = vmatmul.mubr.msk.bf16.gmra.mrb[40].mxu1 %vm1125_vm3, %v4953_v56  ;;  %1438 = vmatprep.mubr.bf16.mxu0 %v4601_v20 }
 0x142   : > { %1551 = vmatprep.mubr.bf16.mxu1 %v4601_v20 }
 0x148   : > { %3719 = vmatmul.mubr.msk.bf16.gmra.mrb[44].mxu0 %vm1125_vm3, %v4340_v62 }
 0x149   : > { %3727 = vmatmul.mubr.msk.bf16.gmra.mrb[44].mxu1 %vm1125_vm3, %v4340_v62  ;;  %1448 = vmatprep.mubr.bf16.mxu0 %v4601_v20 }
 0x14a   : > { %1561 = vmatprep.mubr.bf16.mxu1 %v4601_v20 }
 0x150   : > { %3720 = vmatmul.mubr.msk.bf16.gmra.mrb[48].mxu0 %vm1125_vm3, %v4341_v63 }
 0x151   : > { %3728 = vmatmul.mubr.msk.bf16.gmra.mrb[48].mxu1 %vm1125_vm3, %v4341_v63  ;;  %1458 = vmatprep.mubr.bf16.mxu0 %v4601_v20 }
 0x152   : > { %1571 = vmatprep.mubr.bf16.mxu1 %v4601_v20 }
 0x158   : > { %3721 = vmatmul.mubr.msk.bf16.gmra.mrb[52].mxu0 %vm1125_vm3, %v4342_v0 }
 0x159   : > { %3729 = vmatmul.mubr.msk.bf16.gmra.mrb[52].mxu1 %vm1125_vm3, %v4342_v0  ;;  %1468 = vmatprep.mubr.bf16.mxu0 %v4601_v20 }
 0x15a   : > { %1581 = vmatprep.mubr.bf16.mxu1 %v4601_v20 }
 0x160   : > { %3722 = vmatmul.mubr.msk.bf16.gmra.mrb[56].mxu0 %vm1125_vm3, %v4343_v1 }
 0x161   : > { %3730 = vmatmul.mubr.msk.bf16.gmra.mrb[56].mxu1 %vm1125_vm3, %v4343_v1  ;;  %1478 = vmatprep.mubr.bf16.mxu0 %v4601_v20 }
 0x162   : > { %1591 = vmatprep.mubr.bf16.mxu1 %v4601_v20 }
 0x168   : > { %3723 = vmatmul.mubr.msk.bf16.gmra.mrb[60].mxu0 %vm1125_vm3, %v4344_v2 }
 0x169   : > { %3731 = vmatmul.mubr.msk.bf16.gmra.mrb[60].mxu1 %vm1125_vm3, %v4344_v2  ;;  %1698 = vmatprep.mubr.bf16.mxu0 %v4601_v20 }
 0x16a   : > { %1811 = vmatprep.mubr.bf16.mxu1 %v4601_v20 }
 0x170   : > { %3740 = vmatmul.mubr.msk.bf16.vlgmr.msra.gmra.mrb[0].mxu0 %vm1125_vm3, %v4345_v4 }
 0x171   : > { %1893 = vmatpush1.bf16.msra.mxu0 %v4865_v24  ;;  %3748 = vmatmul.mubr.msk.bf16.vlgmr.msra.gmra.mrb[0].mxu1 %vm1125_vm3, %v4345_v4 }
 0x172   : > { %2006 = vmatpush1.bf16.msra.mxu1 %v4907_v43  ;;  %1894 = vmatprep.subr.bf16.mxu0 %v4830_v13 }
 0x173   : > { %2007 = vmatprep.subr.bf16.mxu1 %v4837_v18  ;;  %1708 = vmatprep.mubr.bf16.mxu0 %v4601_v20 }
 0x174   : > { %1821 = vmatprep.mubr.bf16.mxu1 %v4601_v20 }
 0x175   : > { %1895 = vmatpush1.bf16.msra.mxu0 %v4828_v12 }
 0x176   : > { %1896 = vmatprep.subr.bf16.mxu0 %v4931_v50  ;;  %2008 = vmatpush1.bf16.msra.mxu1 %v4833_v16 }
 0x177   : > { %2009 = vmatprep.subr.bf16.mxu1 %v4970_v61 }
 0x178   : > { %3741 = vmatmul.mubr.msk.bf16.gmra.mrb[4].mxu0 %vm1125_vm3, %v4346_v7 }
 0x179   : > { %1897 = vmatpush1.bf16.msra.mxu0 %v4893_v38  ;;  %3749 = vmatmul.mubr.msk.bf16.gmra.mrb[4].mxu1 %vm1125_vm3, %v4346_v7 }
 0x17a   : > { %2010 = vmatpush1.bf16.msra.mxu1 %v4934_v51  ;;  %2223 = vmatprep.subr.bf16.mxu0 %v4871_v27  ;;  %v2812_v27 = vld [vmem:[%s5590_s3 + $0x48] sm:$0xff] }
 0x17b   : > { %2336 = vmatprep.subr.bf16.mxu1 %v4904_v42  ;;  %1718 = vmatprep.mubr.bf16.mxu0 %v4601_v20 }
 0x17c   : > { %1831 = vmatprep.mubr.bf16.mxu1 %v4601_v20 }
 0x180   : > { %3742 = vmatmul.mubr.msk.bf16.gmra.mrb[8].mxu0 %vm1125_vm3, %v4347_v8 }
 0x181   : > { %3750 = vmatmul.mubr.msk.bf16.gmra.mrb[8].mxu1 %vm1125_vm3, %v4347_v8  ;;  %1728 = vmatprep.mubr.bf16.mxu0 %v4601_v20 }
 0x182   : > { %1841 = vmatprep.mubr.bf16.mxu1 %v4601_v20 }
 0x188   : > { %3743 = vmatmul.mubr.msk.bf16.gmra.mrb[12].mxu0 %vm1125_vm3, %v4348_v9 }
 0x189   : > { %3751 = vmatmul.mubr.msk.bf16.gmra.mrb[12].mxu1 %vm1125_vm3, %v4348_v9  ;;  %1738 = vmatprep.mubr.bf16.mxu0 %v4601_v20 }
 0x18a   : > { %1851 = vmatprep.mubr.bf16.mxu1 %v4601_v20 }
 0x190   : > { %3744 = vmatmul.mubr.msk.bf16.gmra.mrb[16].mxu0 %vm1125_vm3, %v4349_v10 }
 0x191   : > { %3752 = vmatmul.mubr.msk.bf16.gmra.mrb[16].mxu1 %vm1125_vm3, %v4349_v10  ;;  %1748 = vmatprep.mubr.bf16.mxu0 %v4601_v20 }
 0x192   : > { %1861 = vmatprep.mubr.bf16.mxu1 %v4601_v20 }
 0x198   : > { %3745 = vmatmul.mubr.msk.bf16.gmra.mrb[20].mxu0 %vm1125_vm3, %v5107_v11 }
 0x199   : > { %3753 = vmatmul.mubr.msk.bf16.gmra.mrb[20].mxu1 %vm1125_vm3, %v5107_v11  ;;  %1758 = vmatprep.mubr.bf16.mxu0 %v4601_v20 }
 0x19a   : > { %1871 = vmatprep.mubr.bf16.mxu1 %v4601_v20 }
 0x1a0   : > { %3746 = vmatmul.mubr.msk.bf16.gmra.mrb[24].mxu0 %vm1125_vm3, %v5118_v14 }
 0x1a1   : > { %3754 = vmatmul.mubr.msk.bf16.gmra.mrb[24].mxu1 %vm1125_vm3, %v5118_v14  ;;  %1768 = vmatprep.mubr.bf16.mxu0 %v4601_v20 }
 0x1a2   : > { %1881 = vmatprep.mubr.bf16.mxu1 %v4601_v20 }
 0x1a8   : > { %3747 = vmatmul.mubr.msk.bf16.gmra.mrb[28].mxu0 %vm1125_vm3, %v5129_v15 }
 0x1a9   : > { %3755 = vmatmul.mubr.msk.bf16.gmra.mrb[28].mxu1 %vm1125_vm3, %v5129_v15  ;;  %1924 = vmatprep.mubr.bf16.mxu0 %v4601_v20 }
 0x1aa   : > { %2037 = vmatprep.mubr.bf16.mxu1 %v4601_v20 }
 0x1b0   : > { %3756 = vmatmul.mubr.msk.bf16.vlgmr.msra.gmra.mrb[32].mxu0 %vm1125_vm3, %v4345_v4 }
 0x1b1   : > { %2224 = vmatpush1.bf16.msra.mxu0 %v4868_v26  ;;  %3764 = vmatmul.mubr.msk.bf16.vlgmr.msra.gmra.mrb[32].mxu1 %vm1125_vm3, %v4345_v4  ;;  %v2813_v26 = vld [vmem:[%s5590_s3 + $0x50] sm:$0xff] }
 0x1b2   : > { %2337 = vmatpush1.bf16.msra.mxu1 %v4865_v24  ;;  %2225 = vmatprep.subr.bf16.mxu0 %v4820_v5  ;;  %v2803_v5 = vld [vmem:[%s5590_s3] sm:$0xff] }
 0x1b3   : > { %2338 = vmatprep.subr.bf16.mxu1 %v4830_v13  ;;  %1934 = vmatprep.mubr.bf16.mxu0 %v4601_v20  ;;  %v2806_v13 = vld [vmem:[%s5590_s3 + $0x18] sm:$0xff]  ;;  %v2811_v24 = vld [vmem:[%s5590_s3 + $0x40] sm:$0xff] }
 0x1b4   : > { %2047 = vmatprep.mubr.bf16.mxu1 %v4601_v20  ;;  %2821 = vperm.xlu0 %4332, %v2803_v5  }
 0x1b5   : > { %2226 = vmatpush1.bf16.msra.mxu0 %v4822_v6  ;;  %v2804_v6 = vld [vmem:[%s5590_s3 + $0x8] sm:$0xff] }
 0x1b6   : > { %2227 = vmatprep.subr.bf16.mxu0 %v4885_v34  ;;  %2339 = vmatpush1.bf16.msra.mxu1 %v4828_v12  ;;  %v2805_v12 = vld [vmem:[%s5590_s3 + $0x10] sm:$0xff]  ;;  %v4353_v34 = vld [vmem:[%s5589_s2 + $0x80] sm:$0xff]  }
 0x1b7   : > { %2340 = vmatprep.subr.bf16.mxu1 %v4931_v50  ;;  %2826 = vperm.xlu1 %4333, %v2804_v6  }
 0x1b8   : > { %3757 = vmatmul.mubr.msk.bf16.gmra.mrb[36].mxu0 %vm1125_vm3, %v4346_v7  ;;  %2836 = vperm.xlu0 %4332, %v2806_v13  }
 0x1b9   : > { %2228 = vmatpush1.bf16.msra.mxu0 %v4882_v33  ;;  %3765 = vmatmul.mubr.msk.bf16.gmra.mrb[36].mxu1 %vm1125_vm3, %v4346_v7  ;;  %v2818_v33 = vld [vmem:[%s5590_s3 + $0x78] sm:$0xff] }
 0x1ba   : > { %2341 = vmatpush1.bf16.msra.mxu1 %v4893_v38  ;;  %2449 = vmatprep.subr.bf16.mxu0 %v4919_v46  ;;  %v4360_v38 = vld [vmem:[%s5589_s2 + $0xb8] sm:$0xff]  }
 0x1bb   : > { %2562 = vmatprep.subr.bf16.mxu1 %v4958_v58  ;;  %1944 = vmatprep.mubr.bf16.mxu0 %v4601_v20 }
 0x1bc   : > { %2057 = vmatprep.mubr.bf16.mxu1 %v4601_v20  ;;  %2831 = vperm.xlu1 %4333, %v2805_v12  }
 0x1bd   : > { %2846 = vperm.xlu0 %4332, %v2808_v22  }
 0x1c0   : > { %3758 = vmatmul.mubr.msk.bf16.gmra.mrb[40].mxu0 %vm1125_vm3, %v4347_v8  ;;  %2841 = vperm.xlu1 %4333, %v2807_v21  }
 0x1c1   : > { %3766 = vmatmul.mubr.msk.bf16.gmra.mrb[40].mxu1 %vm1125_vm3, %v4347_v8  ;;  %1954 = vmatprep.mubr.bf16.mxu0 %v4601_v20 }
 0x1c2   : > { %2067 = vmatprep.mubr.bf16.mxu1 %v4601_v20  ;;  %2856 = vperm.xlu0 %4332, %v2810_v25  }
 0x1c4   : > { %2851 = vperm.xlu1 %4333, %v2809_v23  }
 0x1c6   : > { %2866 = vperm.xlu0 %4332, %v2812_v27  }
 0x1c8   : > { %3759 = vmatmul.mubr.msk.bf16.gmra.mrb[44].mxu0 %vm1125_vm3, %v4348_v9  ;;  %2861 = vperm.xlu1 %4333, %v2811_v24  }
 0x1c9   : > { %3767 = vmatmul.mubr.msk.bf16.gmra.mrb[44].mxu1 %vm1125_vm3, %v4348_v9  ;;  %1964 = vmatprep.mubr.bf16.mxu0 %v4601_v20 }
 0x1ca   : > { %2077 = vmatprep.mubr.bf16.mxu1 %v4601_v20  ;;  %2876 = vperm.xlu0 %4332, %v2814_v29  }
 0x1cc   : > { %2871 = vperm.xlu1 %4333, %v2813_v26  }
 0x1ce   : > { %2886 = vperm.xlu0 %4332, %v2816_v31  }
 0x1d0   : > { %3760 = vmatmul.mubr.msk.bf16.gmra.mrb[48].mxu0 %vm1125_vm3, %v4349_v10  ;;  %2881 = vperm.xlu1 %4333, %v2815_v28  }
 0x1d1   : > { %3768 = vmatmul.mubr.msk.bf16.gmra.mrb[48].mxu1 %vm1125_vm3, %v4349_v10  ;;  %1974 = vmatprep.mubr.bf16.mxu0 %v4601_v20 }
 0x1d2   : > { %2087 = vmatprep.mubr.bf16.mxu1 %v4601_v20  ;;  %2896 = vperm.xlu0 %4332, %v2818_v33  }
 0x1d4   : > { %2891 = vperm.xlu1 %4333, %v2817_v30  }
 0x1d8   : > { %3761 = vmatmul.mubr.msk.bf16.gmra.mrb[52].mxu0 %vm1125_vm3, %v5107_v11  ;;  %3223 = vperm.xlu1 %4333, %v3220_v32  }
 0x1d9   : > { %3769 = vmatmul.mubr.msk.bf16.gmra.mrb[52].mxu1 %vm1125_vm3, %v5107_v11  ;;  %1984 = vmatprep.mubr.bf16.mxu0 %v4601_v20 }
 0x1da   : > { %2097 = vmatprep.mubr.bf16.mxu1 %v4601_v20 }
 0x1e0   : > { %3762 = vmatmul.mubr.msk.bf16.gmra.mrb[56].mxu0 %vm1125_vm3, %v5118_v14 }
 0x1e1   : > { %3770 = vmatmul.mubr.msk.bf16.gmra.mrb[56].mxu1 %vm1125_vm3, %v5118_v14  ;;  %1994 = vmatprep.mubr.bf16.mxu0 %v4601_v20 }
 0x1e2   : > { %2107 = vmatprep.mubr.bf16.mxu1 %v4601_v20 }
 0x1e8   : > { %3763 = vmatmul.mubr.msk.bf16.gmra.mrb[60].mxu0 %vm1125_vm3, %v5129_v15 }
 0x1e9   : > { %3771 = vmatmul.mubr.msk.bf16.gmra.mrb[60].mxu1 %vm1125_vm3, %v5129_v15  ;;  %2255 = vmatprep.mubr.bf16.mxu0 %v4601_v20 }
 0x1ea   : > { %2368 = vmatprep.mubr.bf16.mxu1 %v4601_v20 }
 0x1f0   : > { %3796 = vmatmul.mubr.msk.bf16.vlgmr.msra.gmra.mrb[0].mxu0 %vm1125_vm3, %v4353_v34 }
 0x1f1   : > { %2450 = vmatpush1.bf16.msra.mxu0 %v4907_v43  ;;  %3804 = vmatmul.mubr.msk.bf16.vlgmr.msra.gmra.mrb[0].mxu1 %vm1125_vm3, %v4353_v34 }
 0x1f2   : > { %2563 = vmatpush1.bf16.msra.mxu1 %v4948_v55  ;;  %2451 = vmatprep.subr.bf16.mxu0 %v4837_v18  ;;  %v4357_v18 = vld [vmem:[%s5589_s2 + $0xa0] sm:$0xff]  }
 0x1f3   : > { %2564 = vmatprep.subr.bf16.mxu1 %v4839_v19  ;;  %2265 = vmatprep.mubr.bf16.mxu0 %v4601_v20  ;;  %v4358_v19 = vld [vmem:[%s5589_s2 + $0xa8] sm:$0xff]  }
 0x1f4   : > { %2378 = vmatprep.mubr.bf16.mxu1 %v4601_v20 }
 0x1f5   : > { %2452 = vmatpush1.bf16.msra.mxu0 %v4833_v16  ;;  %v4355_v16 = vld [vmem:[%s5589_s2 + $0x90] sm:$0xff]  }
 0x1f6   : > { %2453 = vmatprep.subr.bf16.mxu0 %v4970_v61  ;;  %2565 = vmatpush1.bf16.msra.mxu1 %v4835_v17  ;;  %v4356_v17 = vld [vmem:[%s5589_s2 + $0x98] sm:$0xff]  }
 0x1f7   : > { %2566 = vmatprep.subr.bf16.mxu1 %v2141_v36 }
 0x1f8   : > { %3797 = vmatmul.mubr.msk.bf16.gmra.mrb[4].mxu0 %vm1125_vm3, %v4354_v35 }
 0x1f9   : > { %2454 = vmatpush1.bf16.msra.mxu0 %v4934_v51  ;;  %3805 = vmatmul.mubr.msk.bf16.gmra.mrb[4].mxu1 %vm1125_vm3, %v4354_v35 }
 0x1fa   : > { %2567 = vmatpush1.bf16.msra.mxu1 %v4946_v54  ;;  %2275 = vmatprep.mubr.bf16.mxu0 %v4601_v20 }
 0x1fb   : > { %2388 = vmatprep.mubr.bf16.mxu1 %v4601_v20 }
 0x200   : > { %3798 = vmatmul.mubr.msk.bf16.gmra.mrb[8].mxu0 %vm1125_vm3, %v4355_v16 }
 0x201   : > { %3806 = vmatmul.mubr.msk.bf16.gmra.mrb[8].mxu1 %vm1125_vm3, %v4355_v16  ;;  %2285 = vmatprep.mubr.bf16.mxu0 %v4601_v20 }
 0x202   : > { %2398 = vmatprep.mubr.bf16.mxu1 %v4601_v20 }
 0x208   : > { %3799 = vmatmul.mubr.msk.bf16.gmra.mrb[12].mxu0 %vm1125_vm3, %v4356_v17 }
 0x209   : > { %3807 = vmatmul.mubr.msk.bf16.gmra.mrb[12].mxu1 %vm1125_vm3, %v4356_v17  ;;  %2295 = vmatprep.mubr.bf16.mxu0 %v4601_v20 }
 0x20a   : > { %2408 = vmatprep.mubr.bf16.mxu1 %v4601_v20 }
 0x210   : > { %3800 = vmatmul.mubr.msk.bf16.gmra.mrb[16].mxu0 %vm1125_vm3, %v4357_v18 }
 0x211   : > { %3808 = vmatmul.mubr.msk.bf16.gmra.mrb[16].mxu1 %vm1125_vm3, %v4357_v18  ;;  %2305 = vmatprep.mubr.bf16.mxu0 %v4601_v20 }
 0x212   : > { %2418 = vmatprep.mubr.bf16.mxu1 %v4601_v20 }
 0x218   : > { %3801 = vmatmul.mubr.msk.bf16.gmra.mrb[20].mxu0 %vm1125_vm3, %v4358_v19 }
 0x219   : > { %3809 = vmatmul.mubr.msk.bf16.gmra.mrb[20].mxu1 %vm1125_vm3, %v4358_v19  ;;  %2315 = vmatprep.mubr.bf16.mxu0 %v4601_v20 }
 0x21a   : > { %2428 = vmatprep.mubr.bf16.mxu1 %v4601_v20 }
 0x220   : > { %3802 = vmatmul.mubr.msk.bf16.gmra.mrb[24].mxu0 %vm1125_vm3, %v4359_v37 }
 0x221   : > { %3810 = vmatmul.mubr.msk.bf16.gmra.mrb[24].mxu1 %vm1125_vm3, %v4359_v37  ;;  %2325 = vmatprep.mubr.bf16.mxu0 %v4601_v20 }
 0x222   : > { %2438 = vmatprep.mubr.bf16.mxu1 %v4601_v20 }
 0x228   : > { %3803 = vmatmul.mubr.msk.bf16.gmra.mrb[28].mxu0 %vm1125_vm3, %v4360_v38 }
 0x229   : > { %3811 = vmatmul.mubr.msk.bf16.gmra.mrb[28].mxu1 %vm1125_vm3, %v4360_v38  ;;  %2481 = vmatprep.mubr.bf16.mxu0 %v4601_v20 }
 0x22a   : > { %2594 = vmatprep.mubr.bf16.mxu1 %v4601_v20 }
 0x230   : > { %3812 = vmatmul.mubr.msk.bf16.vlgmr.msra.gmra.mrb[32].mxu0 %vm1125_vm3, %v4353_v34 }
 0x231   : > { %3820 = vmatmul.mubr.msk.bf16.vlgmr.msra.gmra.mrb[32].mxu1 %vm1125_vm3, %v4353_v34  ;;  %2491 = vmatprep.mubr.bf16.mxu0 %v4601_v20 }
 0x232   : > { %2604 = vmatprep.mubr.bf16.mxu1 %v4601_v20 }
 0x233   : > { %v5335_v39 = vpop.permute.xlu0 %2821 }
 0x236   : > { %v5337_v41 = vpop.permute.xlu1 %2826 }
 0x237   : > { %v5349_v8 = vpop.permute.xlu0 %2836 }
 0x238   : > { %3813 = vmatmul.mubr.msk.bf16.gmra.mrb[36].mxu0 %vm1125_vm3, %v4354_v35 }
 0x239   : > { %3821 = vmatmul.mubr.msk.bf16.gmra.mrb[36].mxu1 %vm1125_vm3, %v4354_v35  ;;  %2501 = vmatprep.mubr.bf16.mxu0 %v4601_v20 }
 0x23a   : > { %2614 = vmatprep.mubr.bf16.mxu1 %v4601_v20 }
 0x23b   : > { %v5347_v63 = vpop.permute.xlu1 %2831 }
 0x23f   : > { %v5359_v34 = vpop.permute.xlu1 %2841 }
 0x240   : > { %3814 = vmatmul.mubr.msk.bf16.gmra.mrb[40].mxu0 %vm1125_vm3, %v4355_v16 }
 0x241   : > { %3822 = vmatmul.mubr.msk.bf16.gmra.mrb[40].mxu1 %vm1125_vm3, %v4355_v16  ;;  %2511 = vmatprep.mubr.bf16.mxu0 %v4601_v20 }
 0x242   : > { %2624 = vmatprep.mubr.bf16.mxu1 %v4601_v20 }
 0x248   : > { %3815 = vmatmul.mubr.msk.bf16.gmra.mrb[44].mxu0 %vm1125_vm3, %v4356_v17 }
 0x249   : > { %3823 = vmatmul.mubr.msk.bf16.gmra.mrb[44].mxu1 %vm1125_vm3, %v4356_v17  ;;  %2521 = vmatprep.mubr.bf16.mxu0 %v4601_v20 }
 0x24a   : > { %2634 = vmatprep.mubr.bf16.mxu1 %v4601_v20 }
 0x250   : > { %3816 = vmatmul.mubr.msk.bf16.gmra.mrb[48].mxu0 %vm1125_vm3, %v4357_v18 }
 0x251   : > { %3824 = vmatmul.mubr.msk.bf16.gmra.mrb[48].mxu1 %vm1125_vm3, %v4357_v18  ;;  %2531 = vmatprep.mubr.bf16.mxu0 %v4601_v20 }
 0x252   : > { %2644 = vmatprep.mubr.bf16.mxu1 %v4601_v20 }
 0x258   : > { %3817 = vmatmul.mubr.msk.bf16.gmra.mrb[52].mxu0 %vm1125_vm3, %v4358_v19 }
 0x259   : > { %3825 = vmatmul.mubr.msk.bf16.gmra.mrb[52].mxu1 %vm1125_vm3, %v4358_v19  ;;  %2541 = vmatprep.mubr.bf16.mxu0 %v4601_v20 }
 0x25a   : > { %2654 = vmatprep.mubr.bf16.mxu1 %v4601_v20 }
 0x260   : > { %3818 = vmatmul.mubr.msk.bf16.gmra.mrb[56].mxu0 %vm1125_vm3, %v4359_v37 }
 0x261   : > { %3826 = vmatmul.mubr.msk.bf16.gmra.mrb[56].mxu1 %vm1125_vm3, %v4359_v37  ;;  %2551 = vmatprep.mubr.bf16.mxu0 %v4601_v20  ;;  %v5361_v37 = vpop.permute.xlu0 %2846 }
 0x262   : > { %2664 = vmatprep.mubr.bf16.mxu1 %v4601_v20 }
 0x268   : > { %3819 = vmatmul.mubr.msk.bf16.gmra.mrb[60].mxu0 %vm1125_vm3, %v4360_v38 }
 0x269   : > { %3827 = vmatmul.mubr.msk.bf16.gmra.mrb[60].mxu1 %vm1125_vm3, %v4360_v38  ;;  %3258 = vmatprep.mubr.bf16.mxu0 %v4601_v20 }
 0x26a   : > { %3299 = vmatprep.mubr.bf16.mxu1 %v4601_v20 }
 0x2c3   : > { %v2257_v40 = vpop.f32.mrb[0].mxu0 }
 0x2c4   : > { %v2259_v42 = vpop.f32.mrb[1].mxu0  ;;  %v2370_v43 = vpop.f32.mrb[0].mxu1  ;;  %v2899_v44 = vadd.f32 %v5335_v39, %v2257_v40 }
 0x2c5   : > { %v2900_v45 = vadd.f32 %v5335_v39, %v2259_v42  ;;  %v2901_v46 = vadd.f32 %v5335_v39, %v2370_v43  ;;  %v2261_v47 = vpop.f32.mrb[2].mxu0  ;;  %v2372_v48 = vpop.f32.mrb[1].mxu1 }
 0x2c6   : > { %v2907_v49 = vadd.f32 %v5337_v41, %v2261_v47  ;;  %v2902_v50 = vadd.f32 %v5335_v39, %v2372_v48  ;;  %v2263_v51 = vpop.f32.mrb[3].mxu0  ;;  %v2374_v52 = vpop.f32.mrb[2].mxu1  ;;  %v3027_v56 = vmax.f32 %v2899_v44, 0.0 }
 0x2c7   : > { %v2908_v53 = vadd.f32 %v5337_v41, %v2263_v51  ;;  %v2909_v54 = vadd.f32 %v5337_v41, %v2374_v52  ;;  %v2376_v55 = vpop.f32.mrb[3].mxu1  ;;  %v3028_v59 = vmax.f32 %v2900_v45, 0.0  ;;  %v3029_v60 = vmax.f32 %v2901_v46, 0.0 }
 0x2c8   : > { %v3035_v57 = vmax.f32 %v2907_v49, 0.0  ;;  %v2910_v58 = vadd.f32 %v5337_v41, %v2376_v55  ;;  %v3030_v1 = vmax.f32 %v2902_v50, 0.0 }
 0x2c9   : > { %v3036_v61 = vmax.f32 %v2908_v53, 0.0  ;;  %v3037_v62 = vmax.f32 %v2909_v54, 0.0 }
 0x2ca   : > { %v3155_v0 = vpack.c.bf16 %v3035_v57, %v3027_v56  ;;  %v3038_v2 = vmax.f32 %v2910_v58, 0.0  ;;  %v5371_v58 = vpop.permute.xlu1 %2851 }
 0x2cb   : > { %v3156_v3 = vpack.c.bf16 %v3036_v61, %v3028_v59  ;;  %v3157_v4 = vpack.c.bf16 %v3037_v62, %v3029_v60  ;;  %v2267_v7 = vpop.f32.mrb[4].mxu0 }
 0x2cc   : > { %v3158_v9 = vpack.c.bf16 %v3038_v2, %v3030_v1  ;;  %v2915_v10 = vadd.f32 %v5347_v63, %v2267_v7  ;;  %v2269_v11 = vpop.f32.mrb[5].mxu0  ;;  %v2380_v14 = vpop.f32.mrb[4].mxu1 }
 0x2cd   : > { %v2916_v15 = vadd.f32 %v5347_v63, %v2269_v11  ;;  %v2917_v5 = vadd.f32 %v5347_v63, %v2380_v14  ;;  %v2271_v6 = vpop.f32.mrb[6].mxu0  ;;  %v2382_v12 = vpop.f32.mrb[5].mxu1  ;;  %3226 = vmatprep.subr.bf16.mxu0 %v3156_v3 }
 0x2ce   : > { %v2918_v13 = vadd.f32 %v5347_v63, %v2382_v12  ;;  %v2273_v21 = vpop.f32.mrb[7].mxu0  ;;  %v2384_v22 = vpop.f32.mrb[6].mxu1  ;;  %3227 = vmatpush1.bf16.msra.mxu0 %v3155_v0  ;;  %3267 = vmatprep.subr.bf16.mxu1 %v3158_v9  ;;  %v2923_v23 = vadd.f32 %v5349_v8, %v2271_v6  ;;  %v3043_v27 = vmax.f32 %v2915_v10, 0.0 }
 0x2cf   : > { %v2924_v24 = vadd.f32 %v5349_v8, %v2273_v21  ;;  %v2925_v25 = vadd.f32 %v5349_v8, %v2384_v22  ;;  %v2386_v26 = vpop.f32.mrb[7].mxu1  ;;  %3268 = vmatpush1.bf16.msra.mxu1 %v3157_v4  ;;  %v3044_v30 = vmax.f32 %v2916_v15, 0.0  ;;  %v3045_v31 = vmax.f32 %v2917_v5, 0.0  ;;  %v5373_v7 = vpop.permute.xlu0 %2856 }
 0x2d0   : > { %v2926_v28 = vadd.f32 %v5349_v8, %v2386_v26  ;;  %v3051_v29 = vmax.f32 %v2923_v23, 0.0  ;;  %v3046_v35 = vmax.f32 %v2918_v13, 0.0 }
 0x2d1   : > { %v3052_v32 = vmax.f32 %v2924_v24, 0.0  ;;  %v3053_v33 = vmax.f32 %v2925_v25, 0.0 }
 0x2d2   : > { %v3054_v36 = vmax.f32 %v2926_v28, 0.0  ;;  %v3163_v16 = vpack.c.bf16 %v3051_v29, %v3043_v27 }
 0x2d3   : > { %v3164_v17 = vpack.c.bf16 %v3052_v32, %v3044_v30  ;;  %v3165_v18 = vpack.c.bf16 %v3053_v33, %v3045_v31  ;;  %v2277_v19 = vpop.f32.mrb[8].mxu0  ;;  %v5383_v31 = vpop.permute.xlu1 %2861 }
 0x2d4   : > { %v3166_v38 = vpack.c.bf16 %v3054_v36, %v3046_v35  ;;  %v2931_v40 = vadd.f32 %v5359_v34, %v2277_v19  ;;  %v2279_v42 = vpop.f32.mrb[9].mxu0  ;;  %v2390_v43 = vpop.f32.mrb[8].mxu1 }
 0x2d5   : > { %v2932_v44 = vadd.f32 %v5359_v34, %v2279_v42  ;;  %v2933_v45 = vadd.f32 %v5359_v34, %v2390_v43  ;;  %v2281_v46 = vpop.f32.mrb[10].mxu0  ;;  %v2392_v47 = vpop.f32.mrb[9].mxu1  ;;  %3228 = vmatprep.subr.bf16.mxu0 %v3164_v17 }
 0x2d6   : > { %v2939_v48 = vadd.f32 %v5361_v37, %v2281_v46  ;;  %v2934_v49 = vadd.f32 %v5359_v34, %v2392_v47  ;;  %v2283_v50 = vpop.f32.mrb[11].mxu0  ;;  %v2394_v51 = vpop.f32.mrb[10].mxu1  ;;  %3229 = vmatpush1.bf16.msra.mxu0 %v3163_v16  ;;  %3269 = vmatprep.subr.bf16.mxu1 %v3166_v38  ;;  %v3059_v55 = vmax.f32 %v2931_v40, 0.0 }
 0x2d7   : > { %v2940_v52 = vadd.f32 %v5361_v37, %v2283_v50  ;;  %v2941_v53 = vadd.f32 %v5361_v37, %v2394_v51  ;;  %v2396_v54 = vpop.f32.mrb[11].mxu1  ;;  %3270 = vmatpush1.bf16.msra.mxu1 %v3165_v18  ;;  %v3060_v59 = vmax.f32 %v2932_v44, 0.0  ;;  %v3061_v60 = vmax.f32 %v2933_v45, 0.0  ;;  %v5385_v19 = vpop.permute.xlu0 %2866 }
 0x2d8   : > { %v3067_v56 = vmax.f32 %v2939_v48, 0.0  ;;  %v2942_v57 = vadd.f32 %v5361_v37, %v2396_v54  ;;  %v3062_v1 = vmax.f32 %v2934_v49, 0.0 }
 0x2d9   : > { %v3068_v61 = vmax.f32 %v2940_v52, 0.0  ;;  %v3069_v62 = vmax.f32 %v2941_v53, 0.0 }
 0x2da   : > { %v3171_v0 = vpack.c.bf16 %v3067_v56, %v3059_v55  ;;  %v3070_v2 = vmax.f32 %v2942_v57, 0.0 }
 0x2db   : > { %v3172_v3 = vpack.c.bf16 %v3068_v61, %v3060_v59  ;;  %v3173_v4 = vpack.c.bf16 %v3069_v62, %v3061_v60  ;;  %v2287_v9 = vpop.f32.mrb[12].mxu0  ;;  %v5395_v62 = vpop.permute.xlu1 %2871 }
 0x2dc   : > { %v3174_v10 = vpack.c.bf16 %v3070_v2, %v3062_v1  ;;  %v2947_v11 = vadd.f32 %v5371_v58, %v2287_v9  ;;  %v2289_v14 = vpop.f32.mrb[13].mxu0  ;;  %v2400_v15 = vpop.f32.mrb[12].mxu1 }
 0x2dd   : > { %v2948_v5 = vadd.f32 %v5371_v58, %v2289_v14  ;;  %v2949_v6 = vadd.f32 %v5371_v58, %v2400_v15  ;;  %v2291_v12 = vpop.f32.mrb[14].mxu0  ;;  %v2402_v13 = vpop.f32.mrb[13].mxu1  ;;  %3230 = vmatprep.subr.bf16.mxu0 %v3172_v3 }
 0x2de   : > { %v2955_v21 = vadd.f32 %v5373_v7, %v2291_v12  ;;  %v2950_v22 = vadd.f32 %v5371_v58, %v2402_v13  ;;  %v2293_v23 = vpop.f32.mrb[15].mxu0  ;;  %v2404_v24 = vpop.f32.mrb[14].mxu1  ;;  %3231 = vmatpush1.bf16.msra.mxu0 %v3171_v0  ;;  %3271 = vmatprep.subr.bf16.mxu1 %v3174_v10  ;;  %v3075_v28 = vmax.f32 %v2947_v11, 0.0 }
 0x2df   : > { %v2956_v25 = vadd.f32 %v5373_v7, %v2293_v23  ;;  %v2957_v26 = vadd.f32 %v5373_v7, %v2404_v24  ;;  %v2406_v27 = vpop.f32.mrb[15].mxu1  ;;  %3272 = vmatpush1.bf16.msra.mxu1 %v3173_v4  ;;  %v3076_v32 = vmax.f32 %v2948_v5, 0.0  ;;  %v3077_v33 = vmax.f32 %v2949_v6, 0.0  ;;  %v5397_v11 = vpop.permute.xlu0 %2876 }
 0x2e0   : > { %v3083_v29 = vmax.f32 %v2955_v21, 0.0  ;;  %v2958_v30 = vadd.f32 %v5373_v7, %v2406_v27  ;;  %v3078_v17 = vmax.f32 %v2950_v22, 0.0 }
 0x2e1   : > { %v3084_v35 = vmax.f32 %v2956_v25, 0.0  ;;  %v3085_v36 = vmax.f32 %v2957_v26, 0.0 }
 0x2e2   : > { %v3179_v16 = vpack.c.bf16 %v3083_v29, %v3075_v28  ;;  %v3086_v18 = vmax.f32 %v2958_v30, 0.0 }
 0x2e3   : > { %v3180_v38 = vpack.c.bf16 %v3084_v35, %v3076_v32  ;;  %v3181_v40 = vpack.c.bf16 %v3085_v36, %v3077_v33  ;;  %v2297_v42 = vpop.f32.mrb[16].mxu0 }
 0x2e4   : > { %v3182_v43 = vpack.c.bf16 %v3086_v18, %v3078_v17  ;;  %v2963_v44 = vadd.f32 %v5383_v31, %v2297_v42  ;;  %v2299_v45 = vpop.f32.mrb[17].mxu0  ;;  %v2410_v46 = vpop.f32.mrb[16].mxu1 }
 0x2e5   : > { %v2964_v47 = vadd.f32 %v5383_v31, %v2299_v45  ;;  %v2965_v48 = vadd.f32 %v5383_v31, %v2410_v46  ;;  %v2301_v49 = vpop.f32.mrb[18].mxu0  ;;  %v2412_v50 = vpop.f32.mrb[17].mxu1  ;;  %3232 = vmatprep.subr.bf16.mxu0 %v3180_v38 }
 0x2e6   : > { %v2971_v51 = vadd.f32 %v5385_v19, %v2301_v49  ;;  %v2966_v52 = vadd.f32 %v5383_v31, %v2412_v50  ;;  %v2303_v53 = vpop.f32.mrb[19].mxu0  ;;  %v2414_v54 = vpop.f32.mrb[18].mxu1  ;;  %3233 = vmatpush1.bf16.msra.mxu0 %v3179_v16  ;;  %3273 = vmatprep.subr.bf16.mxu1 %v3182_v43  ;;  %v3091_v59 = vmax.f32 %v2963_v44, 0.0 }
 0x2e7   : > { %v2972_v55 = vadd.f32 %v5385_v19, %v2303_v53  ;;  %v2973_v56 = vadd.f32 %v5385_v19, %v2414_v54  ;;  %v2416_v57 = vpop.f32.mrb[19].mxu1  ;;  %3274 = vmatpush1.bf16.msra.mxu1 %v3181_v40  ;;  %v3092_v0 = vmax.f32 %v2964_v47, 0.0  ;;  %v3093_v1 = vmax.f32 %v2965_v48, 0.0  ;;  %v5407_v17 = vpop.permute.xlu1 %2881 }
 0x2e8   : > { %v3099_v60 = vmax.f32 %v2971_v51, 0.0  ;;  %v2974_v61 = vadd.f32 %v5385_v19, %v2416_v57  ;;  %v3094_v9 = vmax.f32 %v2966_v52, 0.0  ;;  %v5409_v46 = vpop.permute.xlu0 %2886 }
 0x2e9   : > { %v3100_v2 = vmax.f32 %v2972_v55, 0.0  ;;  %v3101_v3 = vmax.f32 %v2973_v56, 0.0 }
 0x2ea   : > { %v3187_v4 = vpack.c.bf16 %v3099_v60, %v3091_v59  ;;  %v3102_v10 = vmax.f32 %v2974_v61, 0.0 }
 0x2eb   : > { %v3188_v14 = vpack.c.bf16 %v3100_v2, %v3092_v0  ;;  %v3189_v15 = vpack.c.bf16 %v3101_v3, %v3093_v1  ;;  %v2307_v5 = vpop.f32.mrb[20].mxu0 }
 0x2ec   : > { %v3190_v6 = vpack.c.bf16 %v3102_v10, %v3094_v9  ;;  %v2979_v12 = vadd.f32 %v5395_v62, %v2307_v5  ;;  %v2309_v13 = vpop.f32.mrb[21].mxu0  ;;  %v2420_v21 = vpop.f32.mrb[20].mxu1 }
 0x2ed   : > { %v2980_v22 = vadd.f32 %v5395_v62, %v2309_v13  ;;  %v2981_v23 = vadd.f32 %v5395_v62, %v2420_v21  ;;  %v2311_v24 = vpop.f32.mrb[22].mxu0  ;;  %v2422_v25 = vpop.f32.mrb[21].mxu1  ;;  %3234 = vmatprep.subr.bf16.mxu0 %v3188_v14 }
 0x2ee   : > { %v2987_v26 = vadd.f32 %v5397_v11, %v2311_v24  ;;  %v2982_v27 = vadd.f32 %v5395_v62, %v2422_v25  ;;  %v2313_v28 = vpop.f32.mrb[23].mxu0  ;;  %v2424_v29 = vpop.f32.mrb[22].mxu1  ;;  %3235 = vmatpush1.bf16.msra.mxu0 %v3187_v4  ;;  %3275 = vmatprep.subr.bf16.mxu1 %v3190_v6  ;;  %v3107_v35 = vmax.f32 %v2979_v12, 0.0 }
 0x2ef   : > { %v2988_v30 = vadd.f32 %v5397_v11, %v2313_v28  ;;  %v2989_v32 = vadd.f32 %v5397_v11, %v2424_v29  ;;  %v2426_v33 = vpop.f32.mrb[23].mxu1  ;;  %3276 = vmatpush1.bf16.msra.mxu1 %v3189_v15  ;;  %v3108_v18 = vmax.f32 %v2980_v22, 0.0  ;;  %v3109_v38 = vmax.f32 %v2981_v23, 0.0  ;;  %v5419_v14 = vpop.permute.xlu1 %2891 }
 0x2f0   : > { %v3115_v36 = vmax.f32 %v2987_v26, 0.0  ;;  %v2990_v16 = vadd.f32 %v5397_v11, %v2426_v33  ;;  %v3110_v44 = vmax.f32 %v2982_v27, 0.0  ;;  %v5421_v23 = vpop.permute.xlu0 %2896 }
 0x2f1   : > { %v3116_v40 = vmax.f32 %v2988_v30, 0.0  ;;  %v3117_v42 = vmax.f32 %v2989_v32, 0.0 }
 0x2f2   : > { %v3195_v43 = vpack.c.bf16 %v3115_v36, %v3107_v35  ;;  %v3118_v45 = vmax.f32 %v2990_v16, 0.0 }
 0x2f3   : > { %v3196_v47 = vpack.c.bf16 %v3116_v40, %v3108_v18  ;;  %v3197_v48 = vpack.c.bf16 %v3117_v42, %v3109_v38  ;;  %v2317_v49 = vpop.f32.mrb[24].mxu0 }
 0x2f4   : > { %v3198_v50 = vpack.c.bf16 %v3118_v45, %v3110_v44  ;;  %v2995_v51 = vadd.f32 %v5407_v17, %v2317_v49  ;;  %v2319_v52 = vpop.f32.mrb[25].mxu0  ;;  %v2430_v53 = vpop.f32.mrb[24].mxu1 }
 0x2f5   : > { %v2996_v54 = vadd.f32 %v5407_v17, %v2319_v52  ;;  %v2997_v55 = vadd.f32 %v5407_v17, %v2430_v53  ;;  %v2321_v56 = vpop.f32.mrb[26].mxu0  ;;  %v2432_v57 = vpop.f32.mrb[25].mxu1  ;;  %3236 = vmatprep.subr.bf16.mxu0 %v3196_v47 }
 0x2f6   : > { %v3003_v59 = vadd.f32 %v5409_v46, %v2321_v56  ;;  %v2998_v60 = vadd.f32 %v5407_v17, %v2432_v57  ;;  %v2323_v61 = vpop.f32.mrb[27].mxu0  ;;  %v2434_v0 = vpop.f32.mrb[26].mxu1  ;;  %3237 = vmatpush1.bf16.msra.mxu0 %v3195_v43  ;;  %3277 = vmatprep.subr.bf16.mxu1 %v3198_v50  ;;  %v3123_v4 = vmax.f32 %v2995_v51, 0.0 }
 0x2f7   : > { %v3004_v1 = vadd.f32 %v5409_v46, %v2323_v61  ;;  %v3005_v2 = vadd.f32 %v5409_v46, %v2434_v0  ;;  %v2436_v3 = vpop.f32.mrb[27].mxu1  ;;  %3278 = vmatpush1.bf16.msra.mxu1 %v3197_v48  ;;  %v3124_v15 = vmax.f32 %v2996_v54, 0.0  ;;  %v3125_v5 = vmax.f32 %v2997_v55, 0.0 }
 0x2f8   : > { %v3131_v9 = vmax.f32 %v3003_v59, 0.0  ;;  %v3006_v10 = vadd.f32 %v5409_v46, %v2436_v3  ;;  %v3126_v21 = vmax.f32 %v2998_v60, 0.0 }
 0x2f9   : > { %v3132_v6 = vmax.f32 %v3004_v1, 0.0  ;;  %v3133_v12 = vmax.f32 %v3005_v2, 0.0 }
 0x2fa   : > { %v3203_v13 = vpack.c.bf16 %v3131_v9, %v3123_v4  ;;  %v3134_v22 = vmax.f32 %v3006_v10, 0.0 }
 0x2fb   : > { %v3204_v24 = vpack.c.bf16 %v3132_v6, %v3124_v15  ;;  %v3205_v25 = vpack.c.bf16 %v3133_v12, %v3125_v5  ;;  %v2327_v26 = vpop.f32.mrb[28].mxu0  ;;  %v5439_v12 = vld [vmem:[%s5591_s4] sm:$0xf] }
 0x2fc   : > { %v3206_v27 = vpack.c.bf16 %v3134_v22, %v3126_v21  ;;  %v3011_v28 = vadd.f32 %v5419_v14, %v2327_v26  ;;  %v2329_v29 = vpop.f32.mrb[29].mxu0  ;;  %v2440_v30 = vpop.f32.mrb[28].mxu1 }
 0x2fd   : > { %v3012_v32 = vadd.f32 %v5419_v14, %v2329_v29  ;;  %v3013_v33 = vadd.f32 %v5419_v14, %v2440_v30  ;;  %v2331_v35 = vpop.f32.mrb[30].mxu0  ;;  %v2442_v36 = vpop.f32.mrb[29].mxu1  ;;  %3238 = vmatprep.subr.bf16.mxu0 %v3204_v24 }
 0x2fe   : > { %v3019_v16 = vadd.f32 %v5421_v23, %v2331_v35  ;;  %v3014_v18 = vadd.f32 %v5419_v14, %v2442_v36  ;;  %v2333_v38 = vpop.f32.mrb[31].mxu0  ;;  %v2444_v40 = vpop.f32.mrb[30].mxu1  ;;  %3239 = vmatpush1.bf16.msra.mxu0 %v3203_v13  ;;  %3279 = vmatprep.subr.bf16.mxu1 %v3206_v27  ;;  %v3139_v45 = vmax.f32 %v3011_v28, 0.0 }
 0x2ff   : > { %v3020_v42 = vadd.f32 %v5421_v23, %v2333_v38  ;;  %v3021_v43 = vadd.f32 %v5421_v23, %v2444_v40  ;;  %v2446_v44 = vpop.f32.mrb[31].mxu1  ;;  %3280 = vmatpush1.bf16.msra.mxu1 %v3205_v25  ;;  %v3140_v49 = vmax.f32 %v3012_v32, 0.0  ;;  %v3141_v50 = vmax.f32 %v3013_v33, 0.0 }
 0x300   : > { %v3147_v47 = vmax.f32 %v3019_v16, 0.0  ;;  %v3022_v48 = vadd.f32 %v5421_v23, %v2446_v44  ;;  %v3142_v54 = vmax.f32 %v3014_v18, 0.0 }
 0x301   : > { %v3148_v51 = vmax.f32 %v3020_v42, 0.0  ;;  %v3149_v52 = vmax.f32 %v3021_v43, 0.0 }
 0x302   : > { %v3211_v53 = vpack.c.bf16 %v3147_v47, %v3139_v45  ;;  %v3150_v55 = vmax.f32 %v3022_v48, 0.0 }
 0x303   : > { %v3212_v56 = vpack.c.bf16 %v3148_v51, %v3140_v49  ;;  %v3213_v57 = vpack.c.bf16 %v3149_v52, %v3141_v50  ;;  %v2483_v59 = vpop.f32.mrb[32].mxu0 }
 0x304   : > { %v3214_v60 = vpack.c.bf16 %v3150_v55, %v3142_v54  ;;  %v2903_v61 = vadd.f32 %v5335_v39, %v2483_v59  ;;  %v2485_v0 = vpop.f32.mrb[33].mxu0  ;;  %v2596_v1 = vpop.f32.mrb[32].mxu1 }
 0x305   : > { %v2904_v2 = vadd.f32 %v5335_v39, %v2485_v0  ;;  %v2905_v3 = vadd.f32 %v5335_v39, %v2596_v1  ;;  %v2487_v4 = vpop.f32.mrb[34].mxu0  ;;  %v2598_v9 = vpop.f32.mrb[33].mxu1  ;;  %3240 = vmatprep.subr.bf16.mxu0 %v3212_v56 }
 0x306   : > { %v2911_v10 = vadd.f32 %v5337_v41, %v2487_v4  ;;  %v2906_v15 = vadd.f32 %v5335_v39, %v2598_v9  ;;  %v2489_v5 = vpop.f32.mrb[35].mxu0  ;;  %v2600_v6 = vpop.f32.mrb[34].mxu1  ;;  %3241 = vmatpush1.bf16.msra.mxu0 %v3211_v53  ;;  %3281 = vmatprep.subr.bf16.mxu1 %v3214_v60  ;;  %v3031_v24 = vmax.f32 %v2903_v61, 0.0 }
 0x307   : > { %v2912_v13 = vadd.f32 %v5337_v41, %v2489_v5  ;;  %v2913_v21 = vadd.f32 %v5337_v41, %v2600_v6  ;;  %v2602_v22 = vpop.f32.mrb[35].mxu1  ;;  %3282 = vmatpush1.bf16.msra.mxu1 %v3213_v57  ;;  %v3032_v39 = vmax.f32 %v2904_v2, 0.0  ;;  %v3033_v27 = vmax.f32 %v2905_v3, 0.0 }
 0x308   : > { %v3039_v25 = vmax.f32 %v2911_v10, 0.0  ;;  %v2914_v26 = vadd.f32 %v5337_v41, %v2602_v22  ;;  %v3034_v32 = vmax.f32 %v2906_v15, 0.0 }
 0x309   : > { %v3040_v28 = vmax.f32 %v2912_v13, 0.0  ;;  %v3041_v29 = vmax.f32 %v2913_v21, 0.0  ;;  %3259 = vmatmul.mubr.bf16.vlgmr.msra.gmra.mrb[64].mxu0 %v5439_v12 }
 0x30a   : > { %v3159_v30 = vpack.c.bf16 %v3039_v25, %v3031_v24  ;;  %v3042_v33 = vmax.f32 %v2914_v26, 0.0  ;;  %3300 = vmatmul.mubr.bf16.vlgmr.msra.gmra.mrb[64].mxu1 %v5439_v12  ;;  %3340 = vmatprep.mubr.bf16.mxu0 %v4601_v20 }
 0x30b   : > { %v3160_v35 = vpack.c.bf16 %v3040_v28, %v3032_v39  ;;  %v3161_v36 = vpack.c.bf16 %v3041_v29, %v3033_v27  ;;  %v2493_v16 = vpop.f32.mrb[36].mxu0  ;;  %3381 = vmatprep.mubr.bf16.mxu1 %v4601_v20 }
 0x30c   : > { %v3162_v18 = vpack.c.bf16 %v3042_v33, %v3034_v32  ;;  %v2919_v41 = vadd.f32 %v5347_v63, %v2493_v16  ;;  %v2495_v38 = vpop.f32.mrb[37].mxu0  ;;  %v2606_v40 = vpop.f32.mrb[36].mxu1 }
 0x30d   : > { %v2920_v42 = vadd.f32 %v5347_v63, %v2495_v38  ;;  %v2921_v43 = vadd.f32 %v5347_v63, %v2606_v40  ;;  %v2497_v44 = vpop.f32.mrb[38].mxu0  ;;  %v2608_v45 = vpop.f32.mrb[37].mxu1  ;;  %3308 = vmatprep.subr.bf16.mxu0 %v3160_v35 }
 0x30e   : > { %v2927_v47 = vadd.f32 %v5349_v8, %v2497_v44  ;;  %v2922_v48 = vadd.f32 %v5347_v63, %v2608_v45  ;;  %v2499_v49 = vpop.f32.mrb[39].mxu0  ;;  %v2610_v50 = vpop.f32.mrb[38].mxu1  ;;  %3309 = vmatpush1.bf16.msra.mxu0 %v3159_v30  ;;  %3349 = vmatprep.subr.bf16.mxu1 %v3162_v18  ;;  %v3047_v53 = vmax.f32 %v2919_v41, 0.0 }
 0x30f   : > { %v2928_v20 = vadd.f32 %v5349_v8, %v2499_v49  ;;  %v2929_v51 = vadd.f32 %v5349_v8, %v2610_v50  ;;  %v2612_v52 = vpop.f32.mrb[39].mxu1  ;;  %3350 = vmatpush1.bf16.msra.mxu1 %v3161_v36  ;;  %v3048_v56 = vmax.f32 %v2920_v42, 0.0  ;;  %v3049_v57 = vmax.f32 %v2921_v43, 0.0 }
 0x310   : > { %v3055_v54 = vmax.f32 %v2927_v47, 0.0  ;;  %v2930_v55 = vadd.f32 %v5349_v8, %v2612_v52  ;;  %v3050_v63 = vmax.f32 %v2922_v48, 0.0 }
 0x311   : > { %v3056_v59 = vmax.f32 %v2928_v20, 0.0  ;;  %v3057_v60 = vmax.f32 %v2929_v51, 0.0 }
 0x312   : > { %v3167_v61 = vpack.c.bf16 %v3055_v54, %v3047_v53  ;;  %v3058_v0 = vmax.f32 %v2930_v55, 0.0 }
 0x313   : > { %v3168_v1 = vpack.c.bf16 %v3056_v59, %v3048_v56  ;;  %v3169_v2 = vpack.c.bf16 %v3057_v60, %v3049_v57  ;;  %v2503_v3 = vpop.f32.mrb[40].mxu0 }
 0x314   : > { %v3170_v4 = vpack.c.bf16 %v3058_v0, %v3050_v63  ;;  %v2935_v9 = vadd.f32 %v5359_v34, %v2503_v3  ;;  %v2505_v10 = vpop.f32.mrb[41].mxu0  ;;  %v2616_v15 = vpop.f32.mrb[40].mxu1 }
 0x315   : > { %v2936_v5 = vadd.f32 %v5359_v34, %v2505_v10  ;;  %v2937_v6 = vadd.f32 %v5359_v34, %v2616_v15  ;;  %v2507_v8 = vpop.f32.mrb[42].mxu0  ;;  %v2618_v13 = vpop.f32.mrb[41].mxu1  ;;  %3310 = vmatprep.subr.bf16.mxu0 %v3168_v1 }
 0x316   : > { %v2943_v21 = vadd.f32 %v5361_v37, %v2507_v8  ;;  %v2938_v22 = vadd.f32 %v5359_v34, %v2618_v13  ;;  %v2509_v24 = vpop.f32.mrb[43].mxu0  ;;  %v2620_v25 = vpop.f32.mrb[42].mxu1  ;;  %3311 = vmatpush1.bf16.msra.mxu0 %v3167_v61  ;;  %3351 = vmatprep.subr.bf16.mxu1 %v3170_v4  ;;  %v3063_v28 = vmax.f32 %v2935_v9, 0.0 }
 0x317   : > { %v2944_v26 = vadd.f32 %v5361_v37, %v2509_v24  ;;  %v2945_v39 = vadd.f32 %v5361_v37, %v2620_v25  ;;  %v2622_v27 = vpop.f32.mrb[43].mxu1  ;;  %3352 = vmatpush1.bf16.msra.mxu1 %v3169_v2  ;;  %v3064_v32 = vmax.f32 %v2936_v5, 0.0  ;;  %v3065_v33 = vmax.f32 %v2937_v6, 0.0 }
 0x318   : > { %v3071_v29 = vmax.f32 %v2943_v21, 0.0  ;;  %v2946_v30 = vadd.f32 %v5361_v37, %v2622_v27  ;;  %v3066_v34 = vmax.f32 %v2938_v22, 0.0 }
 0x319   : > { %v3072_v35 = vmax.f32 %v2944_v26, 0.0  ;;  %v3073_v36 = vmax.f32 %v2945_v39, 0.0 }
 0x31a   : > { %v3175_v16 = vpack.c.bf16 %v3071_v29, %v3063_v28  ;;  %v3074_v18 = vmax.f32 %v2946_v30, 0.0 }
 0x31b   : > { %v3176_v41 = vpack.c.bf16 %v3072_v35, %v3064_v32  ;;  %v3177_v38 = vpack.c.bf16 %v3073_v36, %v3065_v33  ;;  %v2513_v40 = vpop.f32.mrb[44].mxu0 }
 0x31c   : > { %v3178_v42 = vpack.c.bf16 %v3074_v18, %v3066_v34  ;;  %v2951_v43 = vadd.f32 %v5371_v58, %v2513_v40  ;;  %v2515_v44 = vpop.f32.mrb[45].mxu0  ;;  %v2626_v45 = vpop.f32.mrb[44].mxu1 }
 0x31d   : > { %v2952_v47 = vadd.f32 %v5371_v58, %v2515_v44  ;;  %v2953_v48 = vadd.f32 %v5371_v58, %v2626_v45  ;;  %v2517_v37 = vpop.f32.mrb[46].mxu0  ;;  %v2628_v49 = vpop.f32.mrb[45].mxu1  ;;  %3312 = vmatprep.subr.bf16.mxu0 %v3176_v41 }
 0x31e   : > { %v2959_v50 = vadd.f32 %v5373_v7, %v2517_v37  ;;  %v2954_v20 = vadd.f32 %v5371_v58, %v2628_v49  ;;  %v2519_v51 = vpop.f32.mrb[47].mxu0  ;;  %v2630_v52 = vpop.f32.mrb[46].mxu1  ;;  %3313 = vmatpush1.bf16.msra.mxu0 %v3175_v16  ;;  %3353 = vmatprep.subr.bf16.mxu1 %v3178_v42  ;;  %v3079_v56 = vmax.f32 %v2951_v43, 0.0 }
 0x31f   : > { %v2960_v53 = vadd.f32 %v5373_v7, %v2519_v51  ;;  %v2961_v54 = vadd.f32 %v5373_v7, %v2630_v52  ;;  %v2632_v55 = vpop.f32.mrb[47].mxu1  ;;  %3354 = vmatpush1.bf16.msra.mxu1 %v3177_v38  ;;  %v3080_v60 = vmax.f32 %v2952_v47, 0.0  ;;  %v3081_v61 = vmax.f32 %v2953_v48, 0.0 }
 0x320   : > { %v3087_v57 = vmax.f32 %v2959_v50, 0.0  ;;  %v2962_v59 = vadd.f32 %v5373_v7, %v2632_v55  ;;  %v3082_v58 = vmax.f32 %v2954_v20, 0.0 }
 0x321   : > { %v3088_v63 = vmax.f32 %v2960_v53, 0.0  ;;  %v3089_v0 = vmax.f32 %v2961_v54, 0.0 }
 0x322   : > { %v3183_v1 = vpack.c.bf16 %v3087_v57, %v3079_v56  ;;  %v3090_v2 = vmax.f32 %v2962_v59, 0.0 }
 0x323   : > { %v3184_v3 = vpack.c.bf16 %v3088_v63, %v3080_v60  ;;  %v3185_v4 = vpack.c.bf16 %v3089_v0, %v3081_v61  ;;  %v2523_v9 = vpop.f32.mrb[48].mxu0 }
 0x324   : > { %v3186_v10 = vpack.c.bf16 %v3090_v2, %v3082_v58  ;;  %v2967_v15 = vadd.f32 %v5383_v31, %v2523_v9  ;;  %v2525_v5 = vpop.f32.mrb[49].mxu0  ;;  %v2636_v6 = vpop.f32.mrb[48].mxu1 }
 0x325   : > { %v2968_v8 = vadd.f32 %v5383_v31, %v2525_v5  ;;  %v2969_v13 = vadd.f32 %v5383_v31, %v2636_v6  ;;  %v2527_v7 = vpop.f32.mrb[50].mxu0  ;;  %v2638_v21 = vpop.f32.mrb[49].mxu1  ;;  %3314 = vmatprep.subr.bf16.mxu0 %v3184_v3 }
 0x326   : > { %v2975_v22 = vadd.f32 %v5385_v19, %v2527_v7  ;;  %v2970_v24 = vadd.f32 %v5383_v31, %v2638_v21  ;;  %v2529_v25 = vpop.f32.mrb[51].mxu0  ;;  %v2640_v26 = vpop.f32.mrb[50].mxu1  ;;  %3315 = vmatpush1.bf16.msra.mxu0 %v3183_v1  ;;  %3355 = vmatprep.subr.bf16.mxu1 %v3186_v10  ;;  %v3095_v29 = vmax.f32 %v2967_v15, 0.0 }
 0x327   : > { %v2976_v39 = vadd.f32 %v5385_v19, %v2529_v25  ;;  %v2977_v27 = vadd.f32 %v5385_v19, %v2640_v26  ;;  %v2642_v28 = vpop.f32.mrb[51].mxu1  ;;  %3356 = vmatpush1.bf16.msra.mxu1 %v3185_v4  ;;  %v3096_v33 = vmax.f32 %v2968_v8, 0.0  ;;  %v3097_v35 = vmax.f32 %v2969_v13, 0.0 }
 0x328   : > { %v3103_v30 = vmax.f32 %v2975_v22, 0.0  ;;  %v2978_v32 = vadd.f32 %v5385_v19, %v2642_v28  ;;  %v3098_v31 = vmax.f32 %v2970_v24, 0.0 }
 0x329   : > { %v3104_v36 = vmax.f32 %v2976_v39, 0.0  ;;  %v3105_v16 = vmax.f32 %v2977_v27, 0.0 }
 0x32a   : > { %v3191_v34 = vpack.c.bf16 %v3103_v30, %v3095_v29  ;;  %v3106_v18 = vmax.f32 %v2978_v32, 0.0 }
 0x32b   : > { %v3192_v41 = vpack.c.bf16 %v3104_v36, %v3096_v33  ;;  %v3193_v38 = vpack.c.bf16 %v3105_v16, %v3097_v35  ;;  %v2533_v40 = vpop.f32.mrb[52].mxu0 }
 0x32c   : > { %v3194_v42 = vpack.c.bf16 %v3106_v18, %v3098_v31  ;;  %v2983_v43 = vadd.f32 %v5395_v62, %v2533_v40  ;;  %v2535_v44 = vpop.f32.mrb[53].mxu0  ;;  %v2646_v45 = vpop.f32.mrb[52].mxu1 }
 0x32d   : > { %v2984_v47 = vadd.f32 %v5395_v62, %v2535_v44  ;;  %v2985_v48 = vadd.f32 %v5395_v62, %v2646_v45  ;;  %v2537_v19 = vpop.f32.mrb[54].mxu0  ;;  %v2648_v37 = vpop.f32.mrb[53].mxu1  ;;  %3316 = vmatprep.subr.bf16.mxu0 %v3192_v41 }
 0x32e   : > { %v2991_v49 = vadd.f32 %v5397_v11, %v2537_v19  ;;  %v2986_v50 = vadd.f32 %v5395_v62, %v2648_v37  ;;  %v2539_v20 = vpop.f32.mrb[55].mxu0  ;;  %v2650_v51 = vpop.f32.mrb[54].mxu1  ;;  %3317 = vmatpush1.bf16.msra.mxu0 %v3191_v34  ;;  %3357 = vmatprep.subr.bf16.mxu1 %v3194_v42  ;;  %v3111_v55 = vmax.f32 %v2983_v43, 0.0 }
 0x32f   : > { %v2992_v52 = vadd.f32 %v5397_v11, %v2539_v20  ;;  %v2993_v53 = vadd.f32 %v5397_v11, %v2650_v51  ;;  %v2652_v54 = vpop.f32.mrb[55].mxu1  ;;  %3358 = vmatpush1.bf16.msra.mxu1 %v3193_v38  ;;  %v3112_v59 = vmax.f32 %v2984_v47, 0.0  ;;  %v3113_v60 = vmax.f32 %v2985_v48, 0.0 }
 0x330   : > { %v3119_v56 = vmax.f32 %v2991_v49, 0.0  ;;  %v2994_v57 = vadd.f32 %v5397_v11, %v2652_v54  ;;  %v3114_v62 = vmax.f32 %v2986_v50, 0.0 }
 0x331   : > { %v3120_v61 = vmax.f32 %v2992_v52, 0.0  ;;  %v3121_v63 = vmax.f32 %v2993_v53, 0.0 }
 0x332   : > { %v3199_v0 = vpack.c.bf16 %v3119_v56, %v3111_v55  ;;  %v3122_v1 = vmax.f32 %v2994_v57, 0.0 }
 0x333   : > { %v3200_v58 = vpack.c.bf16 %v3120_v61, %v3112_v59  ;;  %v3201_v2 = vpack.c.bf16 %v3121_v63, %v3113_v60  ;;  %v2543_v3 = vpop.f32.mrb[56].mxu0 }
 0x334   : > { %v3202_v4 = vpack.c.bf16 %v3122_v1, %v3114_v62  ;;  %v2999_v9 = vadd.f32 %v5407_v17, %v2543_v3  ;;  %v2545_v10 = vpop.f32.mrb[57].mxu0  ;;  %v2656_v15 = vpop.f32.mrb[56].mxu1 }
 0x335   : > { %v3000_v5 = vadd.f32 %v5407_v17, %v2545_v10  ;;  %v3001_v6 = vadd.f32 %v5407_v17, %v2656_v15  ;;  %v2547_v11 = vpop.f32.mrb[58].mxu0  ;;  %v2658_v8 = vpop.f32.mrb[57].mxu1  ;;  %3318 = vmatprep.subr.bf16.mxu0 %v3200_v58 }
 0x336   : > { %v3007_v13 = vadd.f32 %v5409_v46, %v2547_v11  ;;  %v3002_v7 = vadd.f32 %v5407_v17, %v2658_v8  ;;  %v2549_v21 = vpop.f32.mrb[59].mxu0  ;;  %v2660_v22 = vpop.f32.mrb[58].mxu1  ;;  %3319 = vmatpush1.bf16.msra.mxu0 %v3199_v0  ;;  %3359 = vmatprep.subr.bf16.mxu1 %v3202_v4  ;;  %v3127_v39 = vmax.f32 %v2999_v9, 0.0 }
 0x337   : > { %v3008_v24 = vadd.f32 %v5409_v46, %v2549_v21  ;;  %v3009_v25 = vadd.f32 %v5409_v46, %v2660_v22  ;;  %v2662_v26 = vpop.f32.mrb[59].mxu1  ;;  %3360 = vmatpush1.bf16.msra.mxu1 %v3201_v2  ;;  %v3128_v29 = vmax.f32 %v3000_v5, 0.0  ;;  %v3129_v30 = vmax.f32 %v3001_v6, 0.0 }
 0x338   : > { %v3135_v27 = vmax.f32 %v3007_v13, 0.0  ;;  %v3010_v28 = vadd.f32 %v5409_v46, %v2662_v26  ;;  %v3130_v17 = vmax.f32 %v3002_v7, 0.0 }
 0x339   : > { %v3136_v32 = vmax.f32 %v3008_v24, 0.0  ;;  %v3137_v33 = vmax.f32 %v3009_v25, 0.0 }
 0x33a   : > { %v3207_v35 = vpack.c.bf16 %v3135_v27, %v3127_v39  ;;  %v3138_v36 = vmax.f32 %v3010_v28, 0.0 }
 0x33b   : > { %v3208_v16 = vpack.c.bf16 %v3136_v32, %v3128_v29  ;;  %v3209_v34 = vpack.c.bf16 %v3137_v33, %v3129_v30  ;;  %v2553_v31 = vpop.f32.mrb[60].mxu0 }
 0x33c   : > { %v3210_v18 = vpack.c.bf16 %v3138_v36, %v3130_v17  ;;  %v3015_v41 = vadd.f32 %v5419_v14, %v2553_v31  ;;  %v2555_v38 = vpop.f32.mrb[61].mxu0  ;;  %v2666_v40 = vpop.f32.mrb[60].mxu1 }
 0x33d   : > { %v3016_v42 = vadd.f32 %v5419_v14, %v2555_v38  ;;  %v3017_v43 = vadd.f32 %v5419_v14, %v2666_v40  ;;  %v2557_v46 = vpop.f32.mrb[62].mxu0  ;;  %v2668_v44 = vpop.f32.mrb[61].mxu1  ;;  %3320 = vmatprep.subr.bf16.mxu0 %v3208_v16 }
 0x33e   : > { %v3023_v45 = vadd.f32 %v5421_v23, %v2557_v46  ;;  %v3018_v47 = vadd.f32 %v5419_v14, %v2668_v44  ;;  %v2559_v48 = vpop.f32.mrb[63].mxu0  ;;  %v2670_v19 = vpop.f32.mrb[62].mxu1  ;;  %3321 = vmatpush1.bf16.msra.mxu0 %v3207_v35  ;;  %3361 = vmatprep.subr.bf16.mxu1 %v3210_v18  ;;  %v3143_v20 = vmax.f32 %v3015_v41, 0.0 }
 0x33f   : > { %v3024_v37 = vadd.f32 %v5421_v23, %v2559_v48  ;;  %v3025_v49 = vadd.f32 %v5421_v23, %v2670_v19  ;;  %v2672_v50 = vpop.f32.mrb[63].mxu1  ;;  %3362 = vmatpush1.bf16.msra.mxu1 %v3209_v34  ;;  %v3144_v53 = vmax.f32 %v3016_v42, 0.0  ;;  %v3145_v54 = vmax.f32 %v3017_v43, 0.0 }
 0x340   : > { %v3151_v51 = vmax.f32 %v3023_v45, 0.0  ;;  %v3026_v52 = vadd.f32 %v5421_v23, %v2672_v50  ;;  %v3146_v14 = vmax.f32 %v3018_v47, 0.0  ;;  %v3224_v23 = vpop.permute.xlu1 %3223 }
 0x341   : > { %v3152_v55 = vmax.f32 %v3024_v37, 0.0  ;;  %v3153_v56 = vmax.f32 %v3025_v49, 0.0 }
 0x342   : > { %v3215_v57 = vpack.c.bf16 %v3151_v51, %v3143_v20  ;;  %v3154_v59 = vmax.f32 %v3026_v52, 0.0 }
 0x343   : > { %v3216_v60 = vpack.c.bf16 %v3152_v55, %v3144_v53  ;;  %v3217_v61 = vpack.c.bf16 %v3153_v56, %v3145_v54 }
 0x344   : > { %v3218_v63 = vpack.c.bf16 %v3154_v59, %v3146_v14 }
 0x345   : > { %3322 = vmatprep.subr.bf16.mxu0 %v3216_v60 }
 0x346   : > { %3323 = vmatpush1.bf16.msra.mxu0 %v3215_v57  ;;  %3363 = vmatprep.subr.bf16.mxu1 %v3218_v63 }
 0x347   : > { %3364 = vmatpush1.bf16.msra.mxu1 %v3217_v61 }
 0x349   : > { %3341 = vmatmul.mubr.bf16.vlgmr.msra.gmra.mrb[68].mxu0 %v5439_v12 }
 0x34a   : > { %3382 = vmatmul.mubr.bf16.vlgmr.msra.gmra.mrb[68].mxu1 %v5439_v12 }
 0x3dc   : > { %v3260_v0 = vpop.f32.mrb[64].mxu0 }
 0x3dd   : > { %v3261_v62 = vadd.f32 %v3260_v0, %v3224_v23  ;;  %v3262_v1 = vpop.f32.mrb[65].mxu0  ;;  %v3301_v58 = vpop.f32.mrb[64].mxu1 }
 0x3de   : > { %v3263_v2 = vadd.f32 %v3262_v1, %v3224_v23  ;;  %v3302_v3 = vadd.f32 %v3301_v58, %v3224_v23  ;;  %v3303_v4 = vpop.f32.mrb[65].mxu1  ;;  %v3264_v9 = vpop.f32.mrb[66].mxu0 }
 0x3df   : > { %3390 = vst [vmem:[%s5507_s12] sm:$0xff] %v3261_v62  ;;  %v3304_v12 = vadd.f32 %v3303_v4, %v3224_v23  ;;  %v3305_v10 = vpop.f32.mrb[66].mxu1  ;;  %v3265_v15 = vpop.f32.mrb[67].mxu0 }
 0x3e0   : > { %3391 = vst [vmem:[%s5507_s12 + $0x8] sm:$0xff] %v3263_v2  ;;  %3392 = vst [vmem:[%s5507_s12 + $0x10] sm:$0xff] %v3302_v3  ;;  %v3306_v5 = vpop.f32.mrb[67].mxu1 }
 0x3e1   : > { %3393 = vst [vmem:[%s5507_s12 + $0x18] sm:$0xff] %v3304_v12 }
 0x41c   : > { %v3342_v6 = vpop.f32.mrb[68].mxu0 }
 0x41d   : > { %v3343_v11 = vadd.f32 %v3342_v6, %v3224_v23  ;;  %v3344_v8 = vpop.f32.mrb[69].mxu0  ;;  %v3383_v13 = vpop.f32.mrb[68].mxu1 }
 0x41e   : > { %v3345_v7 = vadd.f32 %v3344_v8, %v3224_v23  ;;  %v3384_v21 = vadd.f32 %v3383_v13, %v3224_v23  ;;  %v3385_v22 = vpop.f32.mrb[69].mxu1  ;;  %v3346_v24 = vpop.f32.mrb[70].mxu0 }
 0x41f   : > { %3394 = vst [vmem:[%s5507_s12 + $0x20] sm:$0xff] %v3343_v11  ;;  %v3386_v25 = vadd.f32 %v3385_v22, %v3224_v23  ;;  %v3387_v26 = vpop.f32.mrb[70].mxu1  ;;  %v3347_v39 = vpop.f32.mrb[71].mxu0 }
 0x420   : > { %3395 = vst [vmem:[%s5507_s12 + $0x28] sm:$0xff] %v3345_v7  ;;  %3396 = vst [vmem:[%s5507_s12 + $0x30] sm:$0xff] %v3384_v21  ;;  %v3388_v27 = vpop.f32.mrb[71].mxu1 }
 0x421   : > { %3397 = vst [vmem:[%s5507_s12 + $0x38] sm:$0xff] %v3386_v25 }
 0x422   : > { %4403 = shalt.err (!%p4400_p6)
}
 0x423   : > { %s4404_s18 = scalar_lea.hbm %s5520_s14, 1024  ;;  %s4408_s10 = scalar_lea.hbm %s5617_s19, 4096 }
 0x424   : > { %p4405_p7 = scmp.ne.s32.totalorder %s5520_s14, %s4404_s18  ;;  %p4409_p8 = scmp.lt.u32.totalorder %s5520_s14, %s5617_s19 }
 0x425   : > { %p4410_p12 = scmp.lt.u32.totalorder %s4408_s10, %s4404_s18  ;;  %p4412_p9 = scmp.lt.u32.totalorder %s4404_s18, %s5520_s14 }
 0x426   : > { %p4406_p10 = pnand %p4405_p7, %p5618_p13 }
 0x427   : > { %p4411_p0 = por %p4410_p12, %p4409_p8 }
 0x428   : > { %p4407_p11 = pneg %p4406_p10 }
 0x429   : > { %p4413_p4 = por %p4412_p9, %p4411_p0 }
 0x42b   : > { %p4414_p2 = pnand %p4413_p4, %p4407_p11 }
 0x42d   : > { %4417 = shalt.err (!%p4414_p2)
}
 0x42e   : > { %4101 = dma.vmem_to_hbm [thread:$0]  (%p5618_p13), %s5522_s6, 1024, %s5520_s14, %s3399_s28  }
 0x42f PF: > { %s5619_s20 = sld [smem:[#allocation10_spill]]  ;;  %s5620_s27 = sld [smem:[#allocation16_spill]] }
 0x430   : > { %p4107_p5 = scmp.ge.s32.totalorder %s4578_s7, 2 }
 0x435   : > { %s3427_s16 = sand.u32 1, %s5619_s20   ;;  %p5621_p1 = scmp.ne.s32.totalorder %s5620_s27, 0 }
 0x436   : > { %s3428_s17 = scalar_lea.sflag [#allocation6], %s3427_s16 }
 0x437   : > { %p4104_p3 = pnand %p4107_p5, %p5621_p1 }
 0x439   : > { %4531 = dma.done.wait (!%p4104_p3), %s3428_s17, 1024  }
 0x43a   : > { %4533 = vsyncadd (!%p4104_p3), %s3428_s17, 4294966272  ;;  %s22_s7 = sadd.s32 1, %s4578_s7   ;;  %s5622_s11 = sld [smem:[#allocation15_spill]] }
 0x43b   : > { %p19_p6 = scmp.ge.s32.totalorder %s22_s7, 6   ;;  %s5623_s6 = sld [smem:[#allocation14_spill]] }
 0x43c   : > { %s5624_s14 = sld [smem:[#allocation12_spill]]  ;;  %s5625_s9 = sld [smem:[#allocation13_spill]] }
 0x43d   : > { %s5626_s21 = smov %s4554_s25  ;;  %s5627_s22 = smov %s4546_s23 }
 0x43e   : > { %s5628_s23 = smov %s4550_s24  ;;  %s5630_s25 = smov %s4558_s26 }
 0x43f   : > { %s5632_s27 = smov %s4570_s29  ;;  %s5633_s28 = smov %s4574_s30 }
 0x440   : > { %s5629_s24 = smov %s5622_s11  ;;  %21 = sbr.rel (!%p19_p6) target bundleno = 11 (0xb), region = 227 }
 0x441   : > { %s5631_s26 = smov %s5623_s6 }
 0x442   : > { %s5634_s29 = smov %s5624_s14  ;;  %s5635_s30 = smov %s5625_s9 }
 0x447   :  { %3433 = vsyncpa [#allocation5], 1 }
 0x448   :  { %3435 = vsyncpa [#allocation5 + $0x1], 1 }
 0x449   :  { %3436 = vsyncpa [#allocation6], 1 }
 0x44a   :  { %3438 = vsyncpa [#allocation6 + $0x1], 1 }

</bundles_post_ra>
